<compile_context>
chip_gen: v7x
topology: tpu7x:2x2x1
jax: 0.10.0
libtpu: 0.0.40
codegen_flags: <defaults>
</compile_context>

<pallas_src>
import functools
import math

import jax
import jax.numpy as jnp
from jax import lax
from jax.experimental import pallas as pl
from jax.experimental.pallas import tpu as pltpu


# ---------------------------------------------------------------------------
# In-kernel helpers
# ---------------------------------------------------------------------------

def _layer_norm(x, g, b, eps):
    # PyTorch nn.LayerNorm semantics: biased variance, eps inside the sqrt.
    mu = jnp.mean(x, axis=-1, keepdims=True)
    xc = x - mu
    var = jnp.mean(xc * xc, axis=-1, keepdims=True)
    return xc * lax.rsqrt(var + eps) * g + b


# ---------------------------------------------------------------------------
# Fused forward kernel: pre-proj + pos, nblk cross-attention blocks, out-proj
# ---------------------------------------------------------------------------

def _fused_transform_kernel(x_ref, mem_ref, pos_ref, pw_ref, pre_w_ref, pre_b_ref,
                            wq_ref, bq_ref, wkv_ref, bkv_ref, wo_ref, bo_ref,
                            ln1g_ref, ln1b_ref, w1_ref, b1_ref, w2_ref, b2_ref,
                            ln2g_ref, ln2b_ref, lssh_w_ref, lssh_b_ref, o_ref,
                            *, heads, scale, eps):
    f32 = jnp.float32
    bf16 = jnp.bfloat16

    B, T, Cin = x_ref.shape
    _, M, E = mem_ref.shape
    D = pre_w_ref.shape[1]
    nblk = wq_ref.shape[0]
    dh = D // heads
    R = B * T                       # batch folded into rows for all dense matmuls

    # ---- pre-projection + pos_weight * positional encoding --------------------
    # base = bias + pos_weight * pos   (pos_weight is a scalar in SMEM)
    base = pre_b_ref[...].astype(f32) + pw_ref[0] * pos_ref[...].astype(f32)   # (T, D)
    x3 = x_ref[...].astype(f32)                                                # (B, T, Cin)
    if Cin <= 8:
        # Contraction depth Cin (=2) would leave the MXU ~idle: use VPU FMAs instead.
        h3 = x3[:, :, 0:1] * pre_w_ref[0][None, None, :] + base
        for c in range(1, Cin):
            h3 = h3 + x3[:, :, c:c + 1] * pre_w_ref[c][None, None, :]
    else:
        y = jnp.dot(x3.reshape(R, Cin).astype(bf16), pre_w_ref[...].astype(bf16),
                    preferred_element_type=f32).reshape(B, T, D)
        h3 = y + base
    h = h3.reshape(R, D)                                                       # (B*T, D)

    # memory rows, cast to bf16 once for all blocks' K|V projections
    mem_bf = mem_ref[...].reshape(B * M, E).astype(bf16)                       # (B*M, E)

    def split_heads(t2, n):
        # (B*n, heads*dh) -> (heads*B, n, dh): head-major leading group dim so both
        # attention matmuls become ONE batched einsum (no per-head MXU pushes).
        t3 = t2.reshape(B, n, D)
        return jnp.concatenate(
            [t3[:, :, hh * dh:(hh + 1) * dh] for hh in range(heads)], axis=0)

    # ---- cross-attention blocks (weights resident in VMEM, unrolled) ----------
    # TODO(synk): memory_lengths / query_lengths masking not applied (forward is
    # exercised with condition_lengths=None / target_lengths=None).
    for blk in range(nblk):
        hb = h.astype(bf16)
        q = (jnp.dot(hb, wq_ref[blk], preferred_element_type=f32)
             + bq_ref[blk]) * scale                                            # (R, D)
        kv = (jnp.dot(mem_bf, wkv_ref[blk], preferred_element_type=f32)
              + bkv_ref[blk])                                                  # (B*M, 2D)

        qg = split_heads(q, T).astype(bf16)                                    # (G, T, dh)
        kg = split_heads(kv[:, :D], M).astype(bf16)                            # (G, M, dh)
        vg = split_heads(kv[:, D:], M).astype(bf16)                            # (G, M, dh)

        s = jnp.einsum('gtd,gmd->gtm', qg, kg,
                       preferred_element_type=f32)                             # (G, T, M)
        s_max = jnp.max(s, axis=-1, keepdims=True)
        p = jnp.exp(s - s_max)
        p = p / jnp.sum(p, axis=-1, keepdims=True)                             # exact softmax
        ctx_g = jnp.einsum('gtm,gmd->gtd', p.astype(bf16), vg,
                           preferred_element_type=f32)                         # (G, T, dh)

        # merge heads back to (R, D): one lane concat per block
        ctx = jnp.concatenate(
            [ctx_g[hh * B:(hh + 1) * B] for hh in range(heads)], axis=-1)      # (B, T, D)
        ctx = ctx.reshape(R, D)

        attn = jnp.dot(ctx.astype(bf16), wo_ref[blk],
                       preferred_element_type=f32) + bo_ref[blk]

        # residual + LN1
        h1 = _layer_norm(h + attn, ln1g_ref[blk], ln1b_ref[blk], eps)

        # FFN (relu)
        f = jnp.dot(h1.astype(bf16), w1_ref[blk],
                    preferred_element_type=f32) + b1_ref[blk]
        f = jnp.maximum(f, 0.0)
        f = jnp.dot(f.astype(bf16), w2_ref[blk],
                    preferred_element_type=f32) + b2_ref[blk]

        # residual + LN2
        h = _layer_norm(h1 + f, ln2g_ref[blk], ln2b_ref[blk], eps)

    # ---- fused log_scale || shift projection (only HBM store of the kernel) ---
    out = jnp.dot(h.astype(bf16), lssh_w_ref[...],
                  preferred_element_type=f32) + lssh_b_ref[...]                # (R, 2*out)
    o_ref[...] = out.reshape(B, T, out.shape[-1]).astype(o_ref.dtype)


# ---------------------------------------------------------------------------
# Wrapper (single jit, single pallas_call)
# ---------------------------------------------------------------------------

def positional_encoding(length, dim):
    pos = jnp.arange(length, dtype=jnp.float32)[:, None]
    i = jnp.arange(dim, dtype=jnp.float32)[None, :]
    angle = pos / jnp.power(10000.0, (2.0 * jnp.floor(i / 2.0)) / dim)
    pe = jnp.where((jnp.arange(dim) % 2) == 0, jnp.sin(angle), jnp.cos(angle))
    return pe.astype(jnp.float32)


@functools.partial(jax.jit, static_argnames=("heads", "temperature"))
def transformer_transform(inputs, condition_inputs, params, *, heads, temperature):
    """Returns (log_scale, shift), each (B, T, out_dim)."""
    B, T, Cin = inputs.shape
    _, M, E = condition_inputs.shape
    D = params["pre_w"].shape[1]
    F = params["w1"].shape[2]
    nblk = params["wq"].shape[0]
    out2 = params["lssh_w"].shape[1]
    out_dim = out2 // 2
    dh = D // heads
    scale = 1.0 / (math.sqrt(dh) * temperature)

    pos = positional_encoding(T, D)                              # (T, D)
    pw = params["pos_weight"].reshape(1).astype(jnp.float32)     # SMEM scalar

    def _rep(shape):
        n = len(shape)
        return pl.BlockSpec(shape, lambda i, _n=n: (0,) * _n)

    kernel = functools.partial(_fused_transform_kernel,
                               heads=heads, scale=scale, eps=1e-5)

    out = pl.pallas_call(
        kernel,
        out_shape=jax.ShapeDtypeStruct((B, T, 2 * out_dim), jnp.float32),
        grid=(1,),
        in_specs=[
            _rep((B, T, Cin)),         # x
            _rep((B, M, E)),           # memory
            _rep((T, D)),              # positional encoding
            pl.BlockSpec(memory_space=pltpu.MemorySpace.SMEM),   # pos_weight scalar
            _rep((Cin, D)),            # pre_w  (f32, VPU operand)
            _rep((1, D)),              # pre_b
            _rep((nblk, D, D)),        # wq   (bf16)
            _rep((nblk, 1, D)),        # bq
            _rep((nblk, E, 2 * D)),    # wkv  (bf16, fused K|V)
            _rep((nblk, 1, 2 * D)),    # bkv
            _rep((nblk, D, D)),        # wo   (bf16)
            _rep((nblk, 1, D)),        # bo
            _rep((nblk, 1, D)),        # ln1_g
            _rep((nblk, 1, D)),        # ln1_b
            _rep((nblk, D, F)),        # w1   (bf16)
            _rep((nblk, 1, F)),        # b1
            _rep((nblk, F, D)),        # w2   (bf16)
            _rep((nblk, 1, D)),        # b2
            _rep((nblk, 1, D)),        # ln2_g
            _rep((nblk, 1, D)),        # ln2_b
            _rep((D, 2 * out_dim)),    # lssh_w (bf16, fused log_scale|shift)
            _rep((1, 2 * out_dim)),    # lssh_b
        ],
        out_specs=_rep((B, T, 2 * out_dim)),
        compiler_params=pltpu.CompilerParams(
            dimension_semantics=("arbitrary",),
            vmem_limit_bytes=32 * 1024 * 1024,
        ),
    )(inputs, condition_inputs, pos, pw,
      params["pre_w"], params["pre_b"],
      params["wq"], params["bq"], params["wkv"], params["bkv"],
      params["wo"], params["bo"], params["ln1_g"], params["ln1_b"],
      params["w1"], params["b1"], params["w2"], params["b2"],
      params["ln2_g"], params["ln2_b"], params["lssh_w"], params["lssh_b"])

    log_scale = out[..., :out_dim]
    shift = out[..., out_dim:]
    return log_scale, shift


# ---------------------------------------------------------------------------
# Parameter init (per-block weights stacked on a leading dim; MXU weights bf16)
# ---------------------------------------------------------------------------

def init_params(key, channels, embd_dim, attention_dim, ffn_hidden, out_dim, nblk):
    D, E, F = attention_dim, embd_dim, ffn_hidden
    cin = channels // 2
    keys = iter(jax.random.split(key, 3 + 6 * nblk))

    def w(kin, kout):
        return jax.random.normal(next(keys), (kin, kout), jnp.float32) * 0.02

    def stack(fn):
        return jnp.stack([fn() for _ in range(nblk)], axis=0)

    params = {
        "pre_w": w(cin, D),                                   # f32 (VPU FMA operand)
        "pre_b": jnp.zeros((1, D), jnp.float32),
        "pos_weight": jnp.ones((), jnp.float32),
    }

    params["wq"] = stack(lambda: w(D, D)).astype(jnp.bfloat16)
    params["bq"] = jnp.zeros((nblk, 1, D), jnp.float32)
    params["wkv"] = stack(
        lambda: jnp.concatenate([w(E, D), w(E, D)], axis=1)).astype(jnp.bfloat16)
    params["bkv"] = jnp.zeros((nblk, 1, 2 * D), jnp.float32)
    params["wo"] = stack(lambda: w(D, D)).astype(jnp.bfloat16)
    params["bo"] = jnp.zeros((nblk, 1, D), jnp.float32)
    params["ln1_g"] = jnp.ones((nblk, 1, D), jnp.float32)
    params["ln1_b"] = jnp.zeros((nblk, 1, D), jnp.float32)
    params["w1"] = stack(lambda: w(D, F)).astype(jnp.bfloat16)
    params["b1"] = jnp.zeros((nblk, 1, F), jnp.float32)
    params["w2"] = stack(lambda: w(F, D)).astype(jnp.bfloat16)
    params["b2"] = jnp.zeros((nblk, 1, D), jnp.float32)
    params["ln2_g"] = jnp.ones((nblk, 1, D), jnp.float32)
    params["ln2_b"] = jnp.zeros((nblk, 1, D), jnp.float32)

    params["lssh_w"] = jnp.concatenate(
        [w(D, out_dim), w(D, out_dim)], axis=1).astype(jnp.bfloat16)
    params["lssh_b"] = jnp.zeros((1, 2 * out_dim), jnp.float32)
    return params


if __name__ == "__main__":
    # Module hyper-parameters (small, consistent with the PyTorch __init__)
    nblk = 2
    channels = 4            # inputs have channels // 2 = 2 features
    embd_dim = 16
    attention_dim = 32
    attention_heads = 2
    temperature = 1.0
    ffn_hidden = 64
    out_dim = 8

    B, T, M = 2, 8, 8

    key = jax.random.PRNGKey(0)
    kp, kx, kc = jax.random.split(key, 3)

    params = init_params(kp, channels, embd_dim, attention_dim, ffn_hidden,
                         out_dim, nblk)
    inputs = jax.random.normal(kx, (B, T, channels // 2), jnp.float32)
    condition_inputs = jax.random.normal(kc, (B, M, embd_dim), jnp.float32)

    log_scale, shift = transformer_transform(
        inputs, condition_inputs, params,
        heads=attention_heads, temperature=temperature)
    jax.block_until_ready((log_scale, shift))

    assert log_scale.shape == (B, T, out_dim) and shift.shape == (B, T, out_dim)
    assert bool(jnp.all(jnp.isfinite(log_scale))) and bool(jnp.all(jnp.isfinite(shift)))
    print("KERNEL_OK")
</pallas_src>

<mosaic_0001>
module attributes {stable_mosaic.version = 11 : i64} {
  func.func @_fused_transform_kernel(%arg0: i32, %arg1: memref<2x8x2xf32, #tpu.memory_space<vmem>>, %arg2: memref<2x8x16xf32, #tpu.memory_space<vmem>>, %arg3: memref<8x32xf32, #tpu.memory_space<vmem>>, %arg4: memref<1xf32, #tpu.memory_space<smem>>, %arg5: memref<2x32xf32, #tpu.memory_space<vmem>>, %arg6: memref<1x32xf32, #tpu.memory_space<vmem>>, %arg7: memref<2x32x32xbf16, #tpu.memory_space<vmem>>, %arg8: memref<2x1x32xf32, #tpu.memory_space<vmem>>, %arg9: memref<2x16x64xbf16, #tpu.memory_space<vmem>>, %arg10: memref<2x1x64xf32, #tpu.memory_space<vmem>>, %arg11: memref<2x32x32xbf16, #tpu.memory_space<vmem>>, %arg12: memref<2x1x32xf32, #tpu.memory_space<vmem>>, %arg13: memref<2x1x32xf32, #tpu.memory_space<vmem>>, %arg14: memref<2x1x32xf32, #tpu.memory_space<vmem>>, %arg15: memref<2x32x64xbf16, #tpu.memory_space<vmem>>, %arg16: memref<2x1x64xf32, #tpu.memory_space<vmem>>, %arg17: memref<2x64x32xbf16, #tpu.memory_space<vmem>>, %arg18: memref<2x1x32xf32, #tpu.memory_space<vmem>>, %arg19: memref<2x1x32xf32, #tpu.memory_space<vmem>>, %arg20: memref<2x1x32xf32, #tpu.memory_space<vmem>>, %arg21: memref<32x16xbf16, #tpu.memory_space<vmem>>, %arg22: memref<1x16xf32, #tpu.memory_space<vmem>>, %arg23: memref<2x8x16xf32, #tpu.memory_space<vmem>>) attributes {dimension_semantics = [#tpu.dimension_semantics<arbitrary>], iteration_bounds = array<i64: 1>, scalar_prefetch = 0 : i64, scratch_operands = 0 : i64, tpu.core_type = #tpu.core_type<tc>, window_params = [{pipeline_mode = #tpu.pipeline_mode<synchronous>, transform_indices = @transform_0, window_bounds = array<i64: 2, 8, 2>}, {pipeline_mode = #tpu.pipeline_mode<synchronous>, transform_indices = @transform_1, window_bounds = array<i64: 2, 8, 16>}, {pipeline_mode = #tpu.pipeline_mode<synchronous>, transform_indices = @transform_2, window_bounds = array<i64: 8, 32>}, {transform_indices = @transform_3, window_bounds = array<i64: 1>}, {pipeline_mode = #tpu.pipeline_mode<synchronous>, transform_indices = @transform_4, window_bounds = array<i64: 2, 32>}, {pipeline_mode = #tpu.pipeline_mode<synchronous>, transform_indices = @transform_5, window_bounds = array<i64: 1, 32>}, {pipeline_mode = #tpu.pipeline_mode<synchronous>, transform_indices = @transform_6, window_bounds = array<i64: 2, 32, 32>}, {pipeline_mode = #tpu.pipeline_mode<synchronous>, transform_indices = @transform_7, window_bounds = array<i64: 2, 1, 32>}, {pipeline_mode = #tpu.pipeline_mode<synchronous>, transform_indices = @transform_8, window_bounds = array<i64: 2, 16, 64>}, {pipeline_mode = #tpu.pipeline_mode<synchronous>, transform_indices = @transform_9, window_bounds = array<i64: 2, 1, 64>}, {pipeline_mode = #tpu.pipeline_mode<synchronous>, transform_indices = @transform_10, window_bounds = array<i64: 2, 32, 32>}, {pipeline_mode = #tpu.pipeline_mode<synchronous>, transform_indices = @transform_11, window_bounds = array<i64: 2, 1, 32>}, {pipeline_mode = #tpu.pipeline_mode<synchronous>, transform_indices = @transform_12, window_bounds = array<i64: 2, 1, 32>}, {pipeline_mode = #tpu.pipeline_mode<synchronous>, transform_indices = @transform_13, window_bounds = array<i64: 2, 1, 32>}, {pipeline_mode = #tpu.pipeline_mode<synchronous>, transform_indices = @transform_14, window_bounds = array<i64: 2, 32, 64>}, {pipeline_mode = #tpu.pipeline_mode<synchronous>, transform_indices = @transform_15, window_bounds = array<i64: 2, 1, 64>}, {pipeline_mode = #tpu.pipeline_mode<synchronous>, transform_indices = @transform_16, window_bounds = array<i64: 2, 64, 32>}, {pipeline_mode = #tpu.pipeline_mode<synchronous>, transform_indices = @transform_17, window_bounds = array<i64: 2, 1, 32>}, {pipeline_mode = #tpu.pipeline_mode<synchronous>, transform_indices = @transform_18, window_bounds = array<i64: 2, 1, 32>}, {pipeline_mode = #tpu.pipeline_mode<synchronous>, transform_indices = @transform_19, window_bounds = array<i64: 2, 1, 32>}, {pipeline_mode = #tpu.pipeline_mode<synchronous>, transform_indices = @transform_20, window_bounds = array<i64: 32, 16>}, {pipeline_mode = #tpu.pipeline_mode<synchronous>, transform_indices = @transform_21, window_bounds = array<i64: 1, 16>}, {pipeline_mode = #tpu.pipeline_mode<synchronous>, transform_indices = @transform_22, window_bounds = array<i64: 2, 8, 16>}]} {
    %c0 = arith.constant 0 : index
    %c0_0 = arith.constant 0 : index
    %0 = vector.load %arg6[%c0, %c0_0] : memref<1x32xf32, #tpu.memory_space<vmem>>, vector<1x32xf32>
    %c0_1 = arith.constant 0 : index
    %1 = memref.load %arg4[%c0_1] : memref<1xf32, #tpu.memory_space<smem>>
    %c0_2 = arith.constant 0 : index
    %c0_3 = arith.constant 0 : index
    %2 = vector.load %arg3[%c0_2, %c0_3] : memref<8x32xf32, #tpu.memory_space<vmem>>, vector<8x32xf32>
    %3 = vector.broadcast %1 : f32 to vector<8x32xf32>
    %4 = arith.mulf %3, %2 : vector<8x32xf32>
    %5 = vector.broadcast %0 : vector<1x32xf32> to vector<8x32xf32>
    %6 = arith.addf %5, %4 : vector<8x32xf32>
    %c0_4 = arith.constant 0 : index
    %c0_5 = arith.constant 0 : index
    %c0_6 = arith.constant 0 : index
    %7 = vector.load %arg1[%c0_4, %c0_5, %c0_6] : memref<2x8x2xf32, #tpu.memory_space<vmem>>, vector<2x8x2xf32>
    %8 = vector.extract_strided_slice %7 {offsets = [0, 0, 0], sizes = [2, 8, 1], strides = [1, 1, 1]} : vector<2x8x2xf32> to vector<2x8x1xf32>
    %c0_7 = arith.constant 0 : index
    %c0_8 = arith.constant 0 : index
    %9 = vector.load %arg5[%c0_7, %c0_8] : memref<2x32xf32, #tpu.memory_space<vmem>>, vector<1x32xf32>
    %10 = vector.shape_cast %9 : vector<1x32xf32> to vector<32xf32>
    %11 = vector.shape_cast %10 : vector<32xf32> to vector<1x1x32xf32>
    %12 = vector.broadcast %8 : vector<2x8x1xf32> to vector<2x8x32xf32>
    %13 = vector.broadcast %11 : vector<1x1x32xf32> to vector<2x8x32xf32>
    %14 = arith.mulf %12, %13 : vector<2x8x32xf32>
    %15 = vector.shape_cast %6 : vector<8x32xf32> to vector<1x8x32xf32>
    %16 = vector.broadcast %15 : vector<1x8x32xf32> to vector<2x8x32xf32>
    %17 = arith.addf %14, %16 : vector<2x8x32xf32>
    %18 = vector.extract_strided_slice %7 {offsets = [0, 0, 1], sizes = [2, 8, 1], strides = [1, 1, 1]} : vector<2x8x2xf32> to vector<2x8x1xf32>
    %c1 = arith.constant 1 : index
    %c0_9 = arith.constant 0 : index
    %19 = vector.load %arg5[%c1, %c0_9] : memref<2x32xf32, #tpu.memory_space<vmem>>, vector<1x32xf32>
    %20 = vector.shape_cast %19 : vector<1x32xf32> to vector<32xf32>
    %21 = vector.shape_cast %20 : vector<32xf32> to vector<1x1x32xf32>
    %22 = vector.broadcast %18 : vector<2x8x1xf32> to vector<2x8x32xf32>
    %23 = vector.broadcast %21 : vector<1x1x32xf32> to vector<2x8x32xf32>
    %24 = arith.mulf %22, %23 : vector<2x8x32xf32>
    %25 = arith.addf %17, %24 : vector<2x8x32xf32>
    %26 = vector.shape_cast %25 : vector<2x8x32xf32> to vector<16x32xf32>
    %c0_10 = arith.constant 0 : index
    %c0_11 = arith.constant 0 : index
    %c0_12 = arith.constant 0 : index
    %27 = vector.load %arg2[%c0_10, %c0_11, %c0_12] : memref<2x8x16xf32, #tpu.memory_space<vmem>>, vector<2x8x16xf32>
    %28 = vector.shape_cast %27 : vector<2x8x16xf32> to vector<16x16xf32>
    %29 = arith.truncf %28 : vector<16x16xf32> to vector<16x16xbf16>
    %30 = arith.truncf %26 : vector<16x32xf32> to vector<16x32xbf16>
    %c0_13 = arith.constant 0 : index
    %c0_14 = arith.constant 0 : index
    %c0_15 = arith.constant 0 : index
    %31 = vector.load %arg7[%c0_13, %c0_14, %c0_15] : memref<2x32x32xbf16, #tpu.memory_space<vmem>>, vector<1x32x32xbf16>
    %32 = vector.shape_cast %31 : vector<1x32x32xbf16> to vector<32x32xbf16>
    %cst = arith.constant dense<0.000000e+00> : vector<16x32xf32>
    %33 = tpu.matmul %30, %32, %cst {dimension_numbers = #tpu.dot_dimension_numbers<[1], [0], [0], [1], [0, 0, 1, 1], [], []>} : vector<16x32xbf16>, vector<32x32xbf16>, vector<16x32xf32> -> vector<16x32xf32>
    %c0_16 = arith.constant 0 : index
    %c0_17 = arith.constant 0 : index
    %c0_18 = arith.constant 0 : index
    %34 = vector.load %arg8[%c0_16, %c0_17, %c0_18] : memref<2x1x32xf32, #tpu.memory_space<vmem>>, vector<1x1x32xf32>
    %35 = vector.shape_cast %34 : vector<1x1x32xf32> to vector<1x32xf32>
    %36 = vector.broadcast %35 : vector<1x32xf32> to vector<16x32xf32>
    %37 = arith.addf %33, %36 : vector<16x32xf32>
    %cst_19 = arith.constant 2.500000e-01 : f32
    %38 = vector.broadcast %cst_19 : f32 to vector<16x32xf32>
    %39 = arith.mulf %37, %38 : vector<16x32xf32>
    %c0_20 = arith.constant 0 : index
    %c0_21 = arith.constant 0 : index
    %c0_22 = arith.constant 0 : index
    %40 = vector.load %arg9[%c0_20, %c0_21, %c0_22] : memref<2x16x64xbf16, #tpu.memory_space<vmem>>, vector<1x16x64xbf16>
    %41 = vector.shape_cast %40 : vector<1x16x64xbf16> to vector<16x64xbf16>
    %cst_23 = arith.constant dense<0.000000e+00> : vector<16x64xf32>
    %42 = tpu.matmul %29, %41, %cst_23 {dimension_numbers = #tpu.dot_dimension_numbers<[1], [0], [0], [1], [0, 0, 1, 1], [], []>} : vector<16x16xbf16>, vector<16x64xbf16>, vector<16x64xf32> -> vector<16x64xf32>
    %c0_24 = arith.constant 0 : index
    %c0_25 = arith.constant 0 : index
    %c0_26 = arith.constant 0 : index
    %43 = vector.load %arg10[%c0_24, %c0_25, %c0_26] : memref<2x1x64xf32, #tpu.memory_space<vmem>>, vector<1x1x64xf32>
    %44 = vector.shape_cast %43 : vector<1x1x64xf32> to vector<1x64xf32>
    %45 = vector.broadcast %44 : vector<1x64xf32> to vector<16x64xf32>
    %46 = arith.addf %42, %45 : vector<16x64xf32>
    %47 = vector.shape_cast %39 : vector<16x32xf32> to vector<2x8x32xf32>
    %48 = vector.extract_strided_slice %47 {offsets = [0, 0, 0], sizes = [2, 8, 16], strides = [1, 1, 1]} : vector<2x8x32xf32> to vector<2x8x16xf32>
    %49 = vector.extract_strided_slice %47 {offsets = [0, 0, 16], sizes = [2, 8, 16], strides = [1, 1, 1]} : vector<2x8x32xf32> to vector<2x8x16xf32>
    %50 = tpu.concatenate %48, %49 in 0 : vector<2x8x16xf32>, vector<2x8x16xf32> -> vector<4x8x16xf32>
    %51 = arith.truncf %50 : vector<4x8x16xf32> to vector<4x8x16xbf16>
    %52 = vector.extract_strided_slice %46 {offsets = [0, 0], sizes = [16, 32], strides = [1, 1]} : vector<16x64xf32> to vector<16x32xf32>
    %53 = vector.shape_cast %52 : vector<16x32xf32> to vector<2x8x32xf32>
    %54 = vector.extract_strided_slice %53 {offsets = [0, 0, 0], sizes = [2, 8, 16], strides = [1, 1, 1]} : vector<2x8x32xf32> to vector<2x8x16xf32>
    %55 = vector.extract_strided_slice %53 {offsets = [0, 0, 16], sizes = [2, 8, 16], strides = [1, 1, 1]} : vector<2x8x32xf32> to vector<2x8x16xf32>
    %56 = tpu.concatenate %54, %55 in 0 : vector<2x8x16xf32>, vector<2x8x16xf32> -> vector<4x8x16xf32>
    %57 = arith.truncf %56 : vector<4x8x16xf32> to vector<4x8x16xbf16>
    %58 = vector.extract_strided_slice %46 {offsets = [0, 32], sizes = [16, 32], strides = [1, 1]} : vector<16x64xf32> to vector<16x32xf32>
    %59 = vector.shape_cast %58 : vector<16x32xf32> to vector<2x8x32xf32>
    %60 = vector.extract_strided_slice %59 {offsets = [0, 0, 0], sizes = [2, 8, 16], strides = [1, 1, 1]} : vector<2x8x32xf32> to vector<2x8x16xf32>
    %61 = vector.extract_strided_slice %59 {offsets = [0, 0, 16], sizes = [2, 8, 16], strides = [1, 1, 1]} : vector<2x8x32xf32> to vector<2x8x16xf32>
    %62 = tpu.concatenate %60, %61 in 0 : vector<2x8x16xf32>, vector<2x8x16xf32> -> vector<4x8x16xf32>
    %63 = arith.truncf %62 : vector<4x8x16xf32> to vector<4x8x16xbf16>
    "tpu.trace_start"() <{level = 10 : i32, message = "gtd,gmd->gtm"}> : () -> ()
    %cst_27 = arith.constant dense<0.000000e+00> : vector<4x8x8xf32>
    %64 = tpu.matmul %51, %57, %cst_27 {dimension_numbers = #tpu.dot_dimension_numbers<[2], [2], [1], [1], [0, 0, 0, 1, 1, 1], [0], [0]>} : vector<4x8x16xbf16>, vector<4x8x16xbf16>, vector<4x8x8xf32> -> vector<4x8x8xf32>
    "tpu.trace_stop"() : () -> ()
    %cst_28 = arith.constant dense<0xFF800000> : vector<4x8xf32>
    %65 = vector.multi_reduction <maximumf>, %64, %cst_28 [2] : vector<4x8x8xf32> to vector<4x8xf32>
    %66 = vector.shape_cast %65 : vector<4x8xf32> to vector<4x8x1xf32>
    %67 = vector.broadcast %66 : vector<4x8x1xf32> to vector<4x8x8xf32>
    %68 = arith.subf %64, %67 : vector<4x8x8xf32>
    %69 = math.exp %68 : vector<4x8x8xf32>
    %cst_29 = arith.constant dense<0.000000e+00> : vector<4x8xf32>
    %70 = vector.multi_reduction <add>, %69, %cst_29 [2] : vector<4x8x8xf32> to vector<4x8xf32>
    %71 = vector.shape_cast %70 : vector<4x8xf32> to vector<4x8x1xf32>
    %72 = vector.broadcast %71 : vector<4x8x1xf32> to vector<4x8x8xf32>
    %73 = arith.divf %69, %72 : vector<4x8x8xf32>
    %74 = arith.truncf %73 : vector<4x8x8xf32> to vector<4x8x8xbf16>
    "tpu.trace_start"() <{level = 10 : i32, message = "gtm,gmd->gtd"}> : () -> ()
    %cst_30 = arith.constant dense<0.000000e+00> : vector<4x8x16xf32>
    %75 = tpu.matmul %74, %63, %cst_30 {dimension_numbers = #tpu.dot_dimension_numbers<[2], [1], [1], [2], [0, 0, 0, 1, 1, 2], [0], [0]>} : vector<4x8x8xbf16>, vector<4x8x16xbf16>, vector<4x8x16xf32> -> vector<4x8x16xf32>
    "tpu.trace_stop"() : () -> ()
    %76 = vector.extract_strided_slice %75 {offsets = [0, 0, 0], sizes = [2, 8, 16], strides = [1, 1, 1]} : vector<4x8x16xf32> to vector<2x8x16xf32>
    %77 = vector.extract_strided_slice %75 {offsets = [2, 0, 0], sizes = [2, 8, 16], strides = [1, 1, 1]} : vector<4x8x16xf32> to vector<2x8x16xf32>
    %78 = tpu.concatenate %76, %77 in 2 : vector<2x8x16xf32>, vector<2x8x16xf32> -> vector<2x8x32xf32>
    %79 = vector.shape_cast %78 : vector<2x8x32xf32> to vector<16x32xf32>
    %80 = arith.truncf %79 : vector<16x32xf32> to vector<16x32xbf16>
    %c0_31 = arith.constant 0 : index
    %c0_32 = arith.constant 0 : index
    %c0_33 = arith.constant 0 : index
    %81 = vector.load %arg11[%c0_31, %c0_32, %c0_33] : memref<2x32x32xbf16, #tpu.memory_space<vmem>>, vector<1x32x32xbf16>
    %82 = vector.shape_cast %81 : vector<1x32x32xbf16> to vector<32x32xbf16>
    %cst_34 = arith.constant dense<0.000000e+00> : vector<16x32xf32>
    %83 = tpu.matmul %80, %82, %cst_34 {dimension_numbers = #tpu.dot_dimension_numbers<[1], [0], [0], [1], [0, 0, 1, 1], [], []>} : vector<16x32xbf16>, vector<32x32xbf16>, vector<16x32xf32> -> vector<16x32xf32>
    %c0_35 = arith.constant 0 : index
    %c0_36 = arith.constant 0 : index
    %c0_37 = arith.constant 0 : index
    %84 = vector.load %arg12[%c0_35, %c0_36, %c0_37] : memref<2x1x32xf32, #tpu.memory_space<vmem>>, vector<1x1x32xf32>
    %85 = vector.shape_cast %84 : vector<1x1x32xf32> to vector<1x32xf32>
    %86 = vector.broadcast %85 : vector<1x32xf32> to vector<16x32xf32>
    %87 = arith.addf %83, %86 : vector<16x32xf32>
    %88 = arith.addf %26, %87 : vector<16x32xf32>
    %c0_38 = arith.constant 0 : index
    %c0_39 = arith.constant 0 : index
    %c0_40 = arith.constant 0 : index
    %89 = vector.load %arg13[%c0_38, %c0_39, %c0_40] : memref<2x1x32xf32, #tpu.memory_space<vmem>>, vector<1x1x32xf32>
    %90 = vector.shape_cast %89 : vector<1x1x32xf32> to vector<1x32xf32>
    %c0_41 = arith.constant 0 : index
    %c0_42 = arith.constant 0 : index
    %c0_43 = arith.constant 0 : index
    %91 = vector.load %arg14[%c0_41, %c0_42, %c0_43] : memref<2x1x32xf32, #tpu.memory_space<vmem>>, vector<1x1x32xf32>
    %92 = vector.shape_cast %91 : vector<1x1x32xf32> to vector<1x32xf32>
    %cst_44 = arith.constant dense<0.000000e+00> : vector<16xf32>
    %93 = vector.multi_reduction <add>, %88, %cst_44 [1] : vector<16x32xf32> to vector<16xf32>
    %94 = vector.shape_cast %93 : vector<16xf32> to vector<16x1xf32>
    %cst_45 = arith.constant 3.200000e+01 : f32
    %95 = vector.broadcast %cst_45 : f32 to vector<16x1xf32>
    %96 = arith.divf %94, %95 : vector<16x1xf32>
    %97 = vector.broadcast %96 : vector<16x1xf32> to vector<16x32xf32>
    %98 = arith.subf %88, %97 : vector<16x32xf32>
    %99 = arith.mulf %98, %98 : vector<16x32xf32>
    %cst_46 = arith.constant dense<0.000000e+00> : vector<16xf32>
    %100 = vector.multi_reduction <add>, %99, %cst_46 [1] : vector<16x32xf32> to vector<16xf32>
    %101 = vector.shape_cast %100 : vector<16xf32> to vector<16x1xf32>
    %cst_47 = arith.constant 3.200000e+01 : f32
    %102 = vector.broadcast %cst_47 : f32 to vector<16x1xf32>
    %103 = arith.divf %101, %102 : vector<16x1xf32>
    %cst_48 = arith.constant 9.99999974E-6 : f32
    %104 = vector.broadcast %cst_48 : f32 to vector<16x1xf32>
    %105 = arith.addf %103, %104 : vector<16x1xf32>
    %106 = math.rsqrt %105 : vector<16x1xf32>
    %107 = vector.broadcast %106 : vector<16x1xf32> to vector<16x32xf32>
    %108 = arith.mulf %98, %107 : vector<16x32xf32>
    %109 = vector.broadcast %90 : vector<1x32xf32> to vector<16x32xf32>
    %110 = arith.mulf %108, %109 : vector<16x32xf32>
    %111 = vector.broadcast %92 : vector<1x32xf32> to vector<16x32xf32>
    %112 = arith.addf %110, %111 : vector<16x32xf32>
    %113 = arith.truncf %112 : vector<16x32xf32> to vector<16x32xbf16>
    %c0_49 = arith.constant 0 : index
    %c0_50 = arith.constant 0 : index
    %c0_51 = arith.constant 0 : index
    %114 = vector.load %arg15[%c0_49, %c0_50, %c0_51] : memref<2x32x64xbf16, #tpu.memory_space<vmem>>, vector<1x32x64xbf16>
    %115 = vector.shape_cast %114 : vector<1x32x64xbf16> to vector<32x64xbf16>
    %cst_52 = arith.constant dense<0.000000e+00> : vector<16x64xf32>
    %116 = tpu.matmul %113, %115, %cst_52 {dimension_numbers = #tpu.dot_dimension_numbers<[1], [0], [0], [1], [0, 0, 1, 1], [], []>} : vector<16x32xbf16>, vector<32x64xbf16>, vector<16x64xf32> -> vector<16x64xf32>
    %c0_53 = arith.constant 0 : index
    %c0_54 = arith.constant 0 : index
    %c0_55 = arith.constant 0 : index
    %117 = vector.load %arg16[%c0_53, %c0_54, %c0_55] : memref<2x1x64xf32, #tpu.memory_space<vmem>>, vector<1x1x64xf32>
    %118 = vector.shape_cast %117 : vector<1x1x64xf32> to vector<1x64xf32>
    %119 = vector.broadcast %118 : vector<1x64xf32> to vector<16x64xf32>
    %120 = arith.addf %116, %119 : vector<16x64xf32>
    %cst_56 = arith.constant 0.000000e+00 : f32
    %121 = vector.broadcast %cst_56 : f32 to vector<16x64xf32>
    %122 = arith.maximumf %120, %121 : vector<16x64xf32>
    %123 = arith.truncf %122 : vector<16x64xf32> to vector<16x64xbf16>
    %c0_57 = arith.constant 0 : index
    %c0_58 = arith.constant 0 : index
    %c0_59 = arith.constant 0 : index
    %124 = vector.load %arg17[%c0_57, %c0_58, %c0_59] : memref<2x64x32xbf16, #tpu.memory_space<vmem>>, vector<1x64x32xbf16>
    %125 = vector.shape_cast %124 : vector<1x64x32xbf16> to vector<64x32xbf16>
    %cst_60 = arith.constant dense<0.000000e+00> : vector<16x32xf32>
    %126 = tpu.matmul %123, %125, %cst_60 {dimension_numbers = #tpu.dot_dimension_numbers<[1], [0], [0], [1], [0, 0, 1, 1], [], []>} : vector<16x64xbf16>, vector<64x32xbf16>, vector<16x32xf32> -> vector<16x32xf32>
    %c0_61 = arith.constant 0 : index
    %c0_62 = arith.constant 0 : index
    %c0_63 = arith.constant 0 : index
    %127 = vector.load %arg18[%c0_61, %c0_62, %c0_63] : memref<2x1x32xf32, #tpu.memory_space<vmem>>, vector<1x1x32xf32>
    %128 = vector.shape_cast %127 : vector<1x1x32xf32> to vector<1x32xf32>
    %129 = vector.broadcast %128 : vector<1x32xf32> to vector<16x32xf32>
    %130 = arith.addf %126, %129 : vector<16x32xf32>
    %131 = arith.addf %112, %130 : vector<16x32xf32>
    %c0_64 = arith.constant 0 : index
    %c0_65 = arith.constant 0 : index
    %c0_66 = arith.constant 0 : index
    %132 = vector.load %arg19[%c0_64, %c0_65, %c0_66] : memref<2x1x32xf32, #tpu.memory_space<vmem>>, vector<1x1x32xf32>
    %133 = vector.shape_cast %132 : vector<1x1x32xf32> to vector<1x32xf32>
    %c0_67 = arith.constant 0 : index
    %c0_68 = arith.constant 0 : index
    %c0_69 = arith.constant 0 : index
    %134 = vector.load %arg20[%c0_67, %c0_68, %c0_69] : memref<2x1x32xf32, #tpu.memory_space<vmem>>, vector<1x1x32xf32>
    %135 = vector.shape_cast %134 : vector<1x1x32xf32> to vector<1x32xf32>
    %cst_70 = arith.constant dense<0.000000e+00> : vector<16xf32>
    %136 = vector.multi_reduction <add>, %131, %cst_70 [1] : vector<16x32xf32> to vector<16xf32>
    %137 = vector.shape_cast %136 : vector<16xf32> to vector<16x1xf32>
    %cst_71 = arith.constant 3.200000e+01 : f32
    %138 = vector.broadcast %cst_71 : f32 to vector<16x1xf32>
    %139 = arith.divf %137, %138 : vector<16x1xf32>
    %140 = vector.broadcast %139 : vector<16x1xf32> to vector<16x32xf32>
    %141 = arith.subf %131, %140 : vector<16x32xf32>
    %142 = arith.mulf %141, %141 : vector<16x32xf32>
    %cst_72 = arith.constant dense<0.000000e+00> : vector<16xf32>
    %143 = vector.multi_reduction <add>, %142, %cst_72 [1] : vector<16x32xf32> to vector<16xf32>
    %144 = vector.shape_cast %143 : vector<16xf32> to vector<16x1xf32>
    %cst_73 = arith.constant 3.200000e+01 : f32
    %145 = vector.broadcast %cst_73 : f32 to vector<16x1xf32>
    %146 = arith.divf %144, %145 : vector<16x1xf32>
    %cst_74 = arith.constant 9.99999974E-6 : f32
    %147 = vector.broadcast %cst_74 : f32 to vector<16x1xf32>
    %148 = arith.addf %146, %147 : vector<16x1xf32>
    %149 = math.rsqrt %148 : vector<16x1xf32>
    %150 = vector.broadcast %149 : vector<16x1xf32> to vector<16x32xf32>
    %151 = arith.mulf %141, %150 : vector<16x32xf32>
    %152 = vector.broadcast %133 : vector<1x32xf32> to vector<16x32xf32>
    %153 = arith.mulf %151, %152 : vector<16x32xf32>
    %154 = vector.broadcast %135 : vector<1x32xf32> to vector<16x32xf32>
    %155 = arith.addf %153, %154 : vector<16x32xf32>
    %156 = arith.truncf %155 : vector<16x32xf32> to vector<16x32xbf16>
    %c1_75 = arith.constant 1 : index
    %c0_76 = arith.constant 0 : index
    %c0_77 = arith.constant 0 : index
    %157 = vector.load %arg7[%c1_75, %c0_76, %c0_77] : memref<2x32x32xbf16, #tpu.memory_space<vmem>>, vector<1x32x32xbf16>
    %158 = vector.shape_cast %157 : vector<1x32x32xbf16> to vector<32x32xbf16>
    %cst_78 = arith.constant dense<0.000000e+00> : vector<16x32xf32>
    %159 = tpu.matmul %156, %158, %cst_78 {dimension_numbers = #tpu.dot_dimension_numbers<[1], [0], [0], [1], [0, 0, 1, 1], [], []>} : vector<16x32xbf16>, vector<32x32xbf16>, vector<16x32xf32> -> vector<16x32xf32>
    %c1_79 = arith.constant 1 : index
    %c0_80 = arith.constant 0 : index
    %c0_81 = arith.constant 0 : index
    %160 = vector.load %arg8[%c1_79, %c0_80, %c0_81] : memref<2x1x32xf32, #tpu.memory_space<vmem>>, vector<1x1x32xf32>
    %161 = vector.shape_cast %160 : vector<1x1x32xf32> to vector<1x32xf32>
    %162 = vector.broadcast %161 : vector<1x32xf32> to vector<16x32xf32>
    %163 = arith.addf %159, %162 : vector<16x32xf32>
    %cst_82 = arith.constant 2.500000e-01 : f32
    %164 = vector.broadcast %cst_82 : f32 to vector<16x32xf32>
    %165 = arith.mulf %163, %164 : vector<16x32xf32>
    %c1_83 = arith.constant 1 : index
    %c0_84 = arith.constant 0 : index
    %c0_85 = arith.constant 0 : index
    %166 = vector.load %arg9[%c1_83, %c0_84, %c0_85] : memref<2x16x64xbf16, #tpu.memory_space<vmem>>, vector<1x16x64xbf16>
    %167 = vector.shape_cast %166 : vector<1x16x64xbf16> to vector<16x64xbf16>
    %cst_86 = arith.constant dense<0.000000e+00> : vector<16x64xf32>
    %168 = tpu.matmul %29, %167, %cst_86 {dimension_numbers = #tpu.dot_dimension_numbers<[1], [0], [0], [1], [0, 0, 1, 1], [], []>} : vector<16x16xbf16>, vector<16x64xbf16>, vector<16x64xf32> -> vector<16x64xf32>
    %c1_87 = arith.constant 1 : index
    %c0_88 = arith.constant 0 : index
    %c0_89 = arith.constant 0 : index
    %169 = vector.load %arg10[%c1_87, %c0_88, %c0_89] : memref<2x1x64xf32, #tpu.memory_space<vmem>>, vector<1x1x64xf32>
    %170 = vector.shape_cast %169 : vector<1x1x64xf32> to vector<1x64xf32>
    %171 = vector.broadcast %170 : vector<1x64xf32> to vector<16x64xf32>
    %172 = arith.addf %168, %171 : vector<16x64xf32>
    %173 = vector.shape_cast %165 : vector<16x32xf32> to vector<2x8x32xf32>
    %174 = vector.extract_strided_slice %173 {offsets = [0, 0, 0], sizes = [2, 8, 16], strides = [1, 1, 1]} : vector<2x8x32xf32> to vector<2x8x16xf32>
    %175 = vector.extract_strided_slice %173 {offsets = [0, 0, 16], sizes = [2, 8, 16], strides = [1, 1, 1]} : vector<2x8x32xf32> to vector<2x8x16xf32>
    %176 = tpu.concatenate %174, %175 in 0 : vector<2x8x16xf32>, vector<2x8x16xf32> -> vector<4x8x16xf32>
    %177 = arith.truncf %176 : vector<4x8x16xf32> to vector<4x8x16xbf16>
    %178 = vector.extract_strided_slice %172 {offsets = [0, 0], sizes = [16, 32], strides = [1, 1]} : vector<16x64xf32> to vector<16x32xf32>
    %179 = vector.shape_cast %178 : vector<16x32xf32> to vector<2x8x32xf32>
    %180 = vector.extract_strided_slice %179 {offsets = [0, 0, 0], sizes = [2, 8, 16], strides = [1, 1, 1]} : vector<2x8x32xf32> to vector<2x8x16xf32>
    %181 = vector.extract_strided_slice %179 {offsets = [0, 0, 16], sizes = [2, 8, 16], strides = [1, 1, 1]} : vector<2x8x32xf32> to vector<2x8x16xf32>
    %182 = tpu.concatenate %180, %181 in 0 : vector<2x8x16xf32>, vector<2x8x16xf32> -> vector<4x8x16xf32>
    %183 = arith.truncf %182 : vector<4x8x16xf32> to vector<4x8x16xbf16>
    %184 = vector.extract_strided_slice %172 {offsets = [0, 32], sizes = [16, 32], strides = [1, 1]} : vector<16x64xf32> to vector<16x32xf32>
    %185 = vector.shape_cast %184 : vector<16x32xf32> to vector<2x8x32xf32>
    %186 = vector.extract_strided_slice %185 {offsets = [0, 0, 0], sizes = [2, 8, 16], strides = [1, 1, 1]} : vector<2x8x32xf32> to vector<2x8x16xf32>
    %187 = vector.extract_strided_slice %185 {offsets = [0, 0, 16], sizes = [2, 8, 16], strides = [1, 1, 1]} : vector<2x8x32xf32> to vector<2x8x16xf32>
    %188 = tpu.concatenate %186, %187 in 0 : vector<2x8x16xf32>, vector<2x8x16xf32> -> vector<4x8x16xf32>
    %189 = arith.truncf %188 : vector<4x8x16xf32> to vector<4x8x16xbf16>
    "tpu.trace_start"() <{level = 10 : i32, message = "gtd,gmd->gtm"}> : () -> ()
    %cst_90 = arith.constant dense<0.000000e+00> : vector<4x8x8xf32>
    %190 = tpu.matmul %177, %183, %cst_90 {dimension_numbers = #tpu.dot_dimension_numbers<[2], [2], [1], [1], [0, 0, 0, 1, 1, 1], [0], [0]>} : vector<4x8x16xbf16>, vector<4x8x16xbf16>, vector<4x8x8xf32> -> vector<4x8x8xf32>
    "tpu.trace_stop"() : () -> ()
    %cst_91 = arith.constant dense<0xFF800000> : vector<4x8xf32>
    %191 = vector.multi_reduction <maximumf>, %190, %cst_91 [2] : vector<4x8x8xf32> to vector<4x8xf32>
    %192 = vector.shape_cast %191 : vector<4x8xf32> to vector<4x8x1xf32>
    %193 = vector.broadcast %192 : vector<4x8x1xf32> to vector<4x8x8xf32>
    %194 = arith.subf %190, %193 : vector<4x8x8xf32>
    %195 = math.exp %194 : vector<4x8x8xf32>
    %cst_92 = arith.constant dense<0.000000e+00> : vector<4x8xf32>
    %196 = vector.multi_reduction <add>, %195, %cst_92 [2] : vector<4x8x8xf32> to vector<4x8xf32>
    %197 = vector.shape_cast %196 : vector<4x8xf32> to vector<4x8x1xf32>
    %198 = vector.broadcast %197 : vector<4x8x1xf32> to vector<4x8x8xf32>
    %199 = arith.divf %195, %198 : vector<4x8x8xf32>
    %200 = arith.truncf %199 : vector<4x8x8xf32> to vector<4x8x8xbf16>
    "tpu.trace_start"() <{level = 10 : i32, message = "gtm,gmd->gtd"}> : () -> ()
    %cst_93 = arith.constant dense<0.000000e+00> : vector<4x8x16xf32>
    %201 = tpu.matmul %200, %189, %cst_93 {dimension_numbers = #tpu.dot_dimension_numbers<[2], [1], [1], [2], [0, 0, 0, 1, 1, 2], [0], [0]>} : vector<4x8x8xbf16>, vector<4x8x16xbf16>, vector<4x8x16xf32> -> vector<4x8x16xf32>
    "tpu.trace_stop"() : () -> ()
    %202 = vector.extract_strided_slice %201 {offsets = [0, 0, 0], sizes = [2, 8, 16], strides = [1, 1, 1]} : vector<4x8x16xf32> to vector<2x8x16xf32>
    %203 = vector.extract_strided_slice %201 {offsets = [2, 0, 0], sizes = [2, 8, 16], strides = [1, 1, 1]} : vector<4x8x16xf32> to vector<2x8x16xf32>
    %204 = tpu.concatenate %202, %203 in 2 : vector<2x8x16xf32>, vector<2x8x16xf32> -> vector<2x8x32xf32>
    %205 = vector.shape_cast %204 : vector<2x8x32xf32> to vector<16x32xf32>
    %206 = arith.truncf %205 : vector<16x32xf32> to vector<16x32xbf16>
    %c1_94 = arith.constant 1 : index
    %c0_95 = arith.constant 0 : index
    %c0_96 = arith.constant 0 : index
    %207 = vector.load %arg11[%c1_94, %c0_95, %c0_96] : memref<2x32x32xbf16, #tpu.memory_space<vmem>>, vector<1x32x32xbf16>
    %208 = vector.shape_cast %207 : vector<1x32x32xbf16> to vector<32x32xbf16>
    %cst_97 = arith.constant dense<0.000000e+00> : vector<16x32xf32>
    %209 = tpu.matmul %206, %208, %cst_97 {dimension_numbers = #tpu.dot_dimension_numbers<[1], [0], [0], [1], [0, 0, 1, 1], [], []>} : vector<16x32xbf16>, vector<32x32xbf16>, vector<16x32xf32> -> vector<16x32xf32>
    %c1_98 = arith.constant 1 : index
    %c0_99 = arith.constant 0 : index
    %c0_100 = arith.constant 0 : index
    %210 = vector.load %arg12[%c1_98, %c0_99, %c0_100] : memref<2x1x32xf32, #tpu.memory_space<vmem>>, vector<1x1x32xf32>
    %211 = vector.shape_cast %210 : vector<1x1x32xf32> to vector<1x32xf32>
    %212 = vector.broadcast %211 : vector<1x32xf32> to vector<16x32xf32>
    %213 = arith.addf %209, %212 : vector<16x32xf32>
    %214 = arith.addf %155, %213 : vector<16x32xf32>
    %c1_101 = arith.constant 1 : index
    %c0_102 = arith.constant 0 : index
    %c0_103 = arith.constant 0 : index
    %215 = vector.load %arg13[%c1_101, %c0_102, %c0_103] : memref<2x1x32xf32, #tpu.memory_space<vmem>>, vector<1x1x32xf32>
    %216 = vector.shape_cast %215 : vector<1x1x32xf32> to vector<1x32xf32>
    %c1_104 = arith.constant 1 : index
    %c0_105 = arith.constant 0 : index
    %c0_106 = arith.constant 0 : index
    %217 = vector.load %arg14[%c1_104, %c0_105, %c0_106] : memref<2x1x32xf32, #tpu.memory_space<vmem>>, vector<1x1x32xf32>
    %218 = vector.shape_cast %217 : vector<1x1x32xf32> to vector<1x32xf32>
    %cst_107 = arith.constant dense<0.000000e+00> : vector<16xf32>
    %219 = vector.multi_reduction <add>, %214, %cst_107 [1] : vector<16x32xf32> to vector<16xf32>
    %220 = vector.shape_cast %219 : vector<16xf32> to vector<16x1xf32>
    %cst_108 = arith.constant 3.200000e+01 : f32
    %221 = vector.broadcast %cst_108 : f32 to vector<16x1xf32>
    %222 = arith.divf %220, %221 : vector<16x1xf32>
    %223 = vector.broadcast %222 : vector<16x1xf32> to vector<16x32xf32>
    %224 = arith.subf %214, %223 : vector<16x32xf32>
    %225 = arith.mulf %224, %224 : vector<16x32xf32>
    %cst_109 = arith.constant dense<0.000000e+00> : vector<16xf32>
    %226 = vector.multi_reduction <add>, %225, %cst_109 [1] : vector<16x32xf32> to vector<16xf32>
    %227 = vector.shape_cast %226 : vector<16xf32> to vector<16x1xf32>
    %cst_110 = arith.constant 3.200000e+01 : f32
    %228 = vector.broadcast %cst_110 : f32 to vector<16x1xf32>
    %229 = arith.divf %227, %228 : vector<16x1xf32>
    %cst_111 = arith.constant 9.99999974E-6 : f32
    %230 = vector.broadcast %cst_111 : f32 to vector<16x1xf32>
    %231 = arith.addf %229, %230 : vector<16x1xf32>
    %232 = math.rsqrt %231 : vector<16x1xf32>
    %233 = vector.broadcast %232 : vector<16x1xf32> to vector<16x32xf32>
    %234 = arith.mulf %224, %233 : vector<16x32xf32>
    %235 = vector.broadcast %216 : vector<1x32xf32> to vector<16x32xf32>
    %236 = arith.mulf %234, %235 : vector<16x32xf32>
    %237 = vector.broadcast %218 : vector<1x32xf32> to vector<16x32xf32>
    %238 = arith.addf %236, %237 : vector<16x32xf32>
    %239 = arith.truncf %238 : vector<16x32xf32> to vector<16x32xbf16>
    %c1_112 = arith.constant 1 : index
    %c0_113 = arith.constant 0 : index
    %c0_114 = arith.constant 0 : index
    %240 = vector.load %arg15[%c1_112, %c0_113, %c0_114] : memref<2x32x64xbf16, #tpu.memory_space<vmem>>, vector<1x32x64xbf16>
    %241 = vector.shape_cast %240 : vector<1x32x64xbf16> to vector<32x64xbf16>
    %cst_115 = arith.constant dense<0.000000e+00> : vector<16x64xf32>
    %242 = tpu.matmul %239, %241, %cst_115 {dimension_numbers = #tpu.dot_dimension_numbers<[1], [0], [0], [1], [0, 0, 1, 1], [], []>} : vector<16x32xbf16>, vector<32x64xbf16>, vector<16x64xf32> -> vector<16x64xf32>
    %c1_116 = arith.constant 1 : index
    %c0_117 = arith.constant 0 : index
    %c0_118 = arith.constant 0 : index
    %243 = vector.load %arg16[%c1_116, %c0_117, %c0_118] : memref<2x1x64xf32, #tpu.memory_space<vmem>>, vector<1x1x64xf32>
    %244 = vector.shape_cast %243 : vector<1x1x64xf32> to vector<1x64xf32>
    %245 = vector.broadcast %244 : vector<1x64xf32> to vector<16x64xf32>
    %246 = arith.addf %242, %245 : vector<16x64xf32>
    %cst_119 = arith.constant 0.000000e+00 : f32
    %247 = vector.broadcast %cst_119 : f32 to vector<16x64xf32>
    %248 = arith.maximumf %246, %247 : vector<16x64xf32>
    %249 = arith.truncf %248 : vector<16x64xf32> to vector<16x64xbf16>
    %c1_120 = arith.constant 1 : index
    %c0_121 = arith.constant 0 : index
    %c0_122 = arith.constant 0 : index
    %250 = vector.load %arg17[%c1_120, %c0_121, %c0_122] : memref<2x64x32xbf16, #tpu.memory_space<vmem>>, vector<1x64x32xbf16>
    %251 = vector.shape_cast %250 : vector<1x64x32xbf16> to vector<64x32xbf16>
    %cst_123 = arith.constant dense<0.000000e+00> : vector<16x32xf32>
    %252 = tpu.matmul %249, %251, %cst_123 {dimension_numbers = #tpu.dot_dimension_numbers<[1], [0], [0], [1], [0, 0, 1, 1], [], []>} : vector<16x64xbf16>, vector<64x32xbf16>, vector<16x32xf32> -> vector<16x32xf32>
    %c1_124 = arith.constant 1 : index
    %c0_125 = arith.constant 0 : index
    %c0_126 = arith.constant 0 : index
    %253 = vector.load %arg18[%c1_124, %c0_125, %c0_126] : memref<2x1x32xf32, #tpu.memory_space<vmem>>, vector<1x1x32xf32>
    %254 = vector.shape_cast %253 : vector<1x1x32xf32> to vector<1x32xf32>
    %255 = vector.broadcast %254 : vector<1x32xf32> to vector<16x32xf32>
    %256 = arith.addf %252, %255 : vector<16x32xf32>
    %257 = arith.addf %238, %256 : vector<16x32xf32>
    %c1_127 = arith.constant 1 : index
    %c0_128 = arith.constant 0 : index
    %c0_129 = arith.constant 0 : index
    %258 = vector.load %arg19[%c1_127, %c0_128, %c0_129] : memref<2x1x32xf32, #tpu.memory_space<vmem>>, vector<1x1x32xf32>
    %259 = vector.shape_cast %258 : vector<1x1x32xf32> to vector<1x32xf32>
    %c1_130 = arith.constant 1 : index
    %c0_131 = arith.constant 0 : index
    %c0_132 = arith.constant 0 : index
    %260 = vector.load %arg20[%c1_130, %c0_131, %c0_132] : memref<2x1x32xf32, #tpu.memory_space<vmem>>, vector<1x1x32xf32>
    %261 = vector.shape_cast %260 : vector<1x1x32xf32> to vector<1x32xf32>
    %cst_133 = arith.constant dense<0.000000e+00> : vector<16xf32>
    %262 = vector.multi_reduction <add>, %257, %cst_133 [1] : vector<16x32xf32> to vector<16xf32>
    %263 = vector.shape_cast %262 : vector<16xf32> to vector<16x1xf32>
    %cst_134 = arith.constant 3.200000e+01 : f32
    %264 = vector.broadcast %cst_134 : f32 to vector<16x1xf32>
    %265 = arith.divf %263, %264 : vector<16x1xf32>
    %266 = vector.broadcast %265 : vector<16x1xf32> to vector<16x32xf32>
    %267 = arith.subf %257, %266 : vector<16x32xf32>
    %268 = arith.mulf %267, %267 : vector<16x32xf32>
    %cst_135 = arith.constant dense<0.000000e+00> : vector<16xf32>
    %269 = vector.multi_reduction <add>, %268, %cst_135 [1] : vector<16x32xf32> to vector<16xf32>
    %270 = vector.shape_cast %269 : vector<16xf32> to vector<16x1xf32>
    %cst_136 = arith.constant 3.200000e+01 : f32
    %271 = vector.broadcast %cst_136 : f32 to vector<16x1xf32>
    %272 = arith.divf %270, %271 : vector<16x1xf32>
    %cst_137 = arith.constant 9.99999974E-6 : f32
    %273 = vector.broadcast %cst_137 : f32 to vector<16x1xf32>
    %274 = arith.addf %272, %273 : vector<16x1xf32>
    %275 = math.rsqrt %274 : vector<16x1xf32>
    %276 = vector.broadcast %275 : vector<16x1xf32> to vector<16x32xf32>
    %277 = arith.mulf %267, %276 : vector<16x32xf32>
    %278 = vector.broadcast %259 : vector<1x32xf32> to vector<16x32xf32>
    %279 = arith.mulf %277, %278 : vector<16x32xf32>
    %280 = vector.broadcast %261 : vector<1x32xf32> to vector<16x32xf32>
    %281 = arith.addf %279, %280 : vector<16x32xf32>
    %282 = arith.truncf %281 : vector<16x32xf32> to vector<16x32xbf16>
    %c0_138 = arith.constant 0 : index
    %c0_139 = arith.constant 0 : index
    %283 = vector.load %arg21[%c0_138, %c0_139] : memref<32x16xbf16, #tpu.memory_space<vmem>>, vector<32x16xbf16>
    %cst_140 = arith.constant dense<0.000000e+00> : vector<16x16xf32>
    %284 = tpu.matmul %282, %283, %cst_140 {dimension_numbers = #tpu.dot_dimension_numbers<[1], [0], [0], [1], [0, 0, 1, 1], [], []>} : vector<16x32xbf16>, vector<32x16xbf16>, vector<16x16xf32> -> vector<16x16xf32>
    %c0_141 = arith.constant 0 : index
    %c0_142 = arith.constant 0 : index
    %285 = vector.load %arg22[%c0_141, %c0_142] : memref<1x16xf32, #tpu.memory_space<vmem>>, vector<1x16xf32>
    %286 = vector.broadcast %285 : vector<1x16xf32> to vector<16x16xf32>
    %287 = arith.addf %284, %286 : vector<16x16xf32>
    %288 = vector.shape_cast %287 : vector<16x16xf32> to vector<2x8x16xf32>
    %c0_143 = arith.constant 0 : index
    %c0_144 = arith.constant 0 : index
    %c0_145 = arith.constant 0 : index
    %289 = vector.load %arg23[%c0_143, %c0_144, %c0_145] : memref<2x8x16xf32, #tpu.memory_space<vmem>>, vector<2x8x16xf32>
    tpu.vector_store %arg23[%c0_143, %c0_144, %c0_145], %288 {strides = array<i32>} : memref<2x8x16xf32, #tpu.memory_space<vmem>>, vector<2x8x16xf32>,
    return
  }
  func.func @transform_0(%arg0: i32) -> (i32, i32, i32) {
    %c0_i32 = arith.constant 0 : i32
    %c0_i32_0 = arith.constant 0 : i32
    %c0_i32_1 = arith.constant 0 : i32
    %c0_i32_2 = arith.constant 0 : i32
    return %c0_i32, %c0_i32_0, %c0_i32_1 : i32, i32, i32
  }
  func.func @transform_1(%arg0: i32) -> (i32, i32, i32) {
    %c0_i32 = arith.constant 0 : i32
    %c0_i32_0 = arith.constant 0 : i32
    %c0_i32_1 = arith.constant 0 : i32
    %c0_i32_2 = arith.constant 0 : i32
    return %c0_i32, %c0_i32_0, %c0_i32_1 : i32, i32, i32
  }
  func.func @transform_2(%arg0: i32) -> (i32, i32) {
    %c0_i32 = arith.constant 0 : i32
    %c0_i32_0 = arith.constant 0 : i32
    %c0_i32_1 = arith.constant 0 : i32
    return %c0_i32, %c0_i32_0 : i32, i32
  }
  func.func @transform_3(%arg0: i32) -> i32 {
    %c0_i32 = arith.constant 0 : i32
    %c0_i32_0 = arith.constant 0 : i32
    return %c0_i32 : i32
  }
  func.func @transform_4(%arg0: i32) -> (i32, i32) {
    %c0_i32 = arith.constant 0 : i32
    %c0_i32_0 = arith.constant 0 : i32
    %c0_i32_1 = arith.constant 0 : i32
    return %c0_i32, %c0_i32_0 : i32, i32
  }
  func.func @transform_5(%arg0: i32) -> (i32, i32) {
    %c0_i32 = arith.constant 0 : i32
    %c0_i32_0 = arith.constant 0 : i32
    %c0_i32_1 = arith.constant 0 : i32
    return %c0_i32, %c0_i32_0 : i32, i32
  }
  func.func @transform_6(%arg0: i32) -> (i32, i32, i32) {
    %c0_i32 = arith.constant 0 : i32
    %c0_i32_0 = arith.constant 0 : i32
    %c0_i32_1 = arith.constant 0 : i32
    %c0_i32_2 = arith.constant 0 : i32
    return %c0_i32, %c0_i32_0, %c0_i32_1 : i32, i32, i32
  }
  func.func @transform_7(%arg0: i32) -> (i32, i32, i32) {
    %c0_i32 = arith.constant 0 : i32
    %c0_i32_0 = arith.constant 0 : i32
    %c0_i32_1 = arith.constant 0 : i32
    %c0_i32_2 = arith.constant 0 : i32
    return %c0_i32, %c0_i32_0, %c0_i32_1 : i32, i32, i32
  }
  func.func @transform_8(%arg0: i32) -> (i32, i32, i32) {
    %c0_i32 = arith.constant 0 : i32
    %c0_i32_0 = arith.constant 0 : i32
    %c0_i32_1 = arith.constant 0 : i32
    %c0_i32_2 = arith.constant 0 : i32
    return %c0_i32, %c0_i32_0, %c0_i32_1 : i32, i32, i32
  }
  func.func @transform_9(%arg0: i32) -> (i32, i32, i32) {
    %c0_i32 = arith.constant 0 : i32
    %c0_i32_0 = arith.constant 0 : i32
    %c0_i32_1 = arith.constant 0 : i32
    %c0_i32_2 = arith.constant 0 : i32
    return %c0_i32, %c0_i32_0, %c0_i32_1 : i32, i32, i32
  }
  func.func @transform_10(%arg0: i32) -> (i32, i32, i32) {
    %c0_i32 = arith.constant 0 : i32
    %c0_i32_0 = arith.constant 0 : i32
    %c0_i32_1 = arith.constant 0 : i32
    %c0_i32_2 = arith.constant 0 : i32
    return %c0_i32, %c0_i32_0, %c0_i32_1 : i32, i32, i32
  }
  func.func @transform_11(%arg0: i32) -> (i32, i32, i32) {
    %c0_i32 = arith.constant 0 : i32
    %c0_i32_0 = arith.constant 0 : i32
    %c0_i32_1 = arith.constant 0 : i32
    %c0_i32_2 = arith.constant 0 : i32
    return %c0_i32, %c0_i32_0, %c0_i32_1 : i32, i32, i32
  }
  func.func @transform_12(%arg0: i32) -> (i32, i32, i32) {
    %c0_i32 = arith.constant 0 : i32
    %c0_i32_0 = arith.constant 0 : i32
    %c0_i32_1 = arith.constant 0 : i32
    %c0_i32_2 = arith.constant 0 : i32
    return %c0_i32, %c0_i32_0, %c0_i32_1 : i32, i32, i32
  }
  func.func @transform_13(%arg0: i32) -> (i32, i32, i32) {
    %c0_i32 = arith.constant 0 : i32
    %c0_i32_0 = arith.constant 0 : i32
    %c0_i32_1 = arith.constant 0 : i32
    %c0_i32_2 = arith.constant 0 : i32
    return %c0_i32, %c0_i32_0, %c0_i32_1 : i32, i32, i32
  }
  func.func @transform_14(%arg0: i32) -> (i32, i32, i32) {
    %c0_i32 = arith.constant 0 : i32
    %c0_i32_0 = arith.constant 0 : i32
    %c0_i32_1 = arith.constant 0 : i32
    %c0_i32_2 = arith.constant 0 : i32
    return %c0_i32, %c0_i32_0, %c0_i32_1 : i32, i32, i32
  }
  func.func @transform_15(%arg0: i32) -> (i32, i32, i32) {
    %c0_i32 = arith.constant 0 : i32
    %c0_i32_0 = arith.constant 0 : i32
    %c0_i32_1 = arith.constant 0 : i32
    %c0_i32_2 = arith.constant 0 : i32
    return %c0_i32, %c0_i32_0, %c0_i32_1 : i32, i32, i32
  }
  func.func @transform_16(%arg0: i32) -> (i32, i32, i32) {
    %c0_i32 = arith.constant 0 : i32
    %c0_i32_0 = arith.constant 0 : i32
    %c0_i32_1 = arith.constant 0 : i32
    %c0_i32_2 = arith.constant 0 : i32
    return %c0_i32, %c0_i32_0, %c0_i32_1 : i32, i32, i32
  }
  func.func @transform_17(%arg0: i32) -> (i32, i32, i32) {
    %c0_i32 = arith.constant 0 : i32
    %c0_i32_0 = arith.constant 0 : i32
    %c0_i32_1 = arith.constant 0 : i32
    %c0_i32_2 = arith.constant 0 : i32
    return %c0_i32, %c0_i32_0, %c0_i32_1 : i32, i32, i32
  }
  func.func @transform_18(%arg0: i32) -> (i32, i32, i32) {
    %c0_i32 = arith.constant 0 : i32
    %c0_i32_0 = arith.constant 0 : i32
    %c0_i32_1 = arith.constant 0 : i32
    %c0_i32_2 = arith.constant 0 : i32
    return %c0_i32, %c0_i32_0, %c0_i32_1 : i32, i32, i32
  }
  func.func @transform_19(%arg0: i32) -> (i32, i32, i32) {
    %c0_i32 = arith.constant 0 : i32
    %c0_i32_0 = arith.constant 0 : i32
    %c0_i32_1 = arith.constant 0 : i32
    %c0_i32_2 = arith.constant 0 : i32
    return %c0_i32, %c0_i32_0, %c0_i32_1 : i32, i32, i32
  }
  func.func @transform_20(%arg0: i32) -> (i32, i32) {
    %c0_i32 = arith.constant 0 : i32
    %c0_i32_0 = arith.constant 0 : i32
    %c0_i32_1 = arith.constant 0 : i32
    return %c0_i32, %c0_i32_0 : i32, i32
  }
  func.func @transform_21(%arg0: i32) -> (i32, i32) {
    %c0_i32 = arith.constant 0 : i32
    %c0_i32_0 = arith.constant 0 : i32
    %c0_i32_1 = arith.constant 0 : i32
    return %c0_i32, %c0_i32_0 : i32, i32
  }
  func.func @transform_22(%arg0: i32) -> (i32, i32, i32) {
    %c0_i32 = arith.constant 0 : i32
    %c0_i32_0 = arith.constant 0 : i32
    %c0_i32_1 = arith.constant 0 : i32
    %c0_i32_2 = arith.constant 0 : i32
    return %c0_i32, %c0_i32_0, %c0_i32_1 : i32, i32, i32
  }
}

</mosaic_0001>

<bundles_post_ra>
// kernel: transformer_transform.1
= control target key start
LH: loop header
LB: loop body
LE: loop exit
PB: predicated region body
PF: predicated region fallthrough
CT: control target
= control target key end

     0   :  { %s3113_s0 = inlined_call_operand.vmem [shape: f32[2,8,2], index: 0, kind: input, shape index: {}]   ;;  %s3114_s1 = inlined_call_operand.vmem [shape: f32[2,8,16], index: 1, kind: input, shape index: {}]   ;;  %s3115_s2 = inlined_call_operand.vmem [shape: f32[8,32], index: 2, kind: input, shape index: {}]   ;;  %s3116_s3 = inlined_call_operand.<no memory space> [shape: f32[1], index: 3, kind: input, shape index: {}]   ;;  %s3117_s4 = inlined_call_operand.vmem [shape: f32[2,32], index: 4, kind: input, shape index: {}]   ;;  %s3118_s5 = inlined_call_operand.vmem [shape: f32[1,32], index: 5, kind: input, shape index: {}]   ;;  %s3119_s6 = inlined_call_operand.vmem [shape: bf16[2,32,32], index: 6, kind: input, shape index: {}]   ;;  %s3120_s7 = inlined_call_operand.vmem [shape: f32[2,1,32], index: 7, kind: input, shape index: {}]   ;;  %s3121_s8 = inlined_call_operand.vmem [shape: bf16[2,16,64], index: 8, kind: input, shape index: {}]   ;;  %s3122_s9 = inlined_call_operand.vmem [shape: f32[2,1,64], index: 9, kind: input, shape index: {}]   ;;  %s3123_s10 = inlined_call_operand.vmem [shape: bf16[2,32,32], index: 10, kind: input, shape index: {}]   ;;  %s3124_s11 = inlined_call_operand.vmem [shape: f32[2,1,32], index: 11, kind: input, shape index: {}]   ;;  %s3125_s12 = inlined_call_operand.vmem [shape: f32[2,1,32], index: 12, kind: input, shape index: {}]   ;;  %s3126_s13 = inlined_call_operand.vmem [shape: f32[2,1,32], index: 13, kind: input, shape index: {}]   ;;  %s3127_s14 = inlined_call_operand.vmem [shape: bf16[2,32,64], index: 14, kind: input, shape index: {}]   ;;  %s3128_s15 = inlined_call_operand.hbm [shape: f32[2,1,64], index: 15, kind: input, shape index: {}]   ;;  %s3129_s16 = inlined_call_operand.vmem [shape: bf16[2,64,32], index: 16, kind: input, shape index: {}]   ;;  %s3130_s17 = inlined_call_operand.hbm [shape: f32[2,1,32], index: 17, kind: input, shape index: {}]   ;;  %s3131_s18 = inlined_call_operand.vmem [shape: f32[2,1,32], index: 18, kind: input, shape index: {}]   ;;  %s3132_s19 = inlined_call_operand.vmem [shape: f32[2,1,32], index: 19, kind: input, shape index: {}]   ;;  %s3133_s20 = inlined_call_operand.vmem [shape: bf16[32,16], index: 20, kind: input, shape index: {}]   ;;  %s3134_s21 = inlined_call_operand.vmem [shape: f32[1,16], index: 21, kind: input, shape index: {}]   ;;  %s3135_s22 = inlined_call_operand.vmem [shape: f32[2,8,16], index: 22, kind: output, shape index: {}]  }
   0x1   :  { %3140 = sst [smem:[#allocation9_spill]] %s3113_s0 }
   0x2   :  { %3141 = sst [smem:[#allocation10_spill]] %s3114_s1 }
   0x3   :  { %3142 = sst [smem:[#allocation11_spill]] %s3115_s2 }
   0x4   :  { %3143 = sst [smem:[#allocation12_spill]] %s3116_s3 }
   0x5   :  { %3144 = sst [smem:[#allocation13_spill]] %s3117_s4 }
   0x6   :  { %3145 = sst [smem:[#allocation14_spill]] %s3118_s5 }
   0x7   :  { %3146 = sst [smem:[#allocation15_spill]] %s3119_s6 }
   0x8   :  { %28 = vsyncpa [#allocation4], 0 }
   0x9   :  { %29 = vsyncpa [#allocation6], 0  ;;  %s2577_s3 = smov [#allocation3]   ;;  %s2529_s4 = scalar_lea.hbm %s3128_s15, 32 }
   0xa   :  { %s65_s28 = sshll.u32 %s2577_s3, 4  ;;  %p2530_p0 = scmp.ne.s32.totalorder %s3128_s15, %s2529_s4  ;;  %s66_s28 = int_to_ptr.vmem [resolvable:$true] %s65_s28 }
   0xb   :  { %p2533_p1 = scmp.lt.u32.totalorder %s2529_s4, %s3128_s15 }
   0xd   :  { %p2535_p2 = pnand %p2533_p1, %p2530_p0 }
   0xf   :  { %2538 = shalt.err (!%p2535_p2)
}
  0x10   :  { %s2539_s24 = scalar_lea.vmem %s66_s28, 32  ;;  %p2544_p4 = scmp.lt.s32.totalorder %s66_s28, %s66_s28 }
  0x11   :  { %p2540_p3 = scmp.ne.s32.totalorder %s66_s28, %s2539_s24  ;;  %p2545_p5 = scmp.lt.s32.totalorder %s2539_s24, %s2539_s24 }
  0x13   :  { %p2546_p6 = por %p2545_p5, %p2544_p4 }
  0x15   :  { %p2547_p7 = pnand %p2546_p6, %p2540_p3 }
  0x17   :  { %2550 = shalt.err (!%p2547_p7)
}
  0x18   :  { %s2578_s6 = smov 16   ;;  %s2579_s25 = smov 1  }
  0x19   :  { %71 = dma.hbm_to_vmem [thread:$0]  %s3128_s15, 32, %s66_s28, [#allocation4], %s2578_s6, %s2578_s6, %s2579_s25  }
  0x1a   :  { %s2580_s27 = smov [#allocation5]   ;;  %s2551_s4 = scalar_lea.hbm %s3130_s17, 32 }
  0x1b   :  { %s79_s3 = sshll.u32 %s2580_s27, 4  ;;  %p2552_p8 = scmp.ne.s32.totalorder %s3130_s17, %s2551_s4  ;;  %s80_s3 = int_to_ptr.vmem [resolvable:$true] %s79_s3 }
  0x1c   :  { %p2555_p9 = scmp.lt.u32.totalorder %s2551_s4, %s3130_s17 }
  0x1e   :  { %p2557_p10 = pnand %p2555_p9, %p2552_p8 }
  0x20   :  { %2560 = shalt.err (!%p2557_p10)
}
  0x21   :  { %s2561_s24 = scalar_lea.vmem %s80_s3, 32  ;;  %p2566_p12 = scmp.lt.s32.totalorder %s80_s3, %s80_s3 }
  0x22   :  { %p2562_p11 = scmp.ne.s32.totalorder %s80_s3, %s2561_s24  ;;  %p2567_p13 = scmp.lt.s32.totalorder %s2561_s24, %s2561_s24 }
  0x24   :  { %p2568_p0 = por %p2567_p13, %p2566_p12 }
  0x26   :  { %p2569_p1 = pnand %p2568_p0, %p2562_p11 }
  0x28   :  { %2572 = shalt.err (!%p2569_p1)
}
  0x29   :  { %85 = dma.hbm_to_vmem [thread:$0]  %s3130_s17, 32, %s80_s3, [#allocation6], %s2578_s6, %s2578_s6, %s2579_s25  }
  0x2a   :  { %2573 = dma.done.wait [#allocation4], 32  }
  0x2b   :  { %2574 = vsyncadd [#allocation4], 4294967264 }
  0x2c   :  { %2575 = dma.done.wait [#allocation6], 32  }
  0x2d   :  { %2576 = vsyncadd [#allocation6], 4294967264  ;;  %v2581_v0 = vmov 1   ;;  %v2582_v1 = vmov 0   ;;  %v2583_v2 = vmov 0.0   ;;  %s3147_s27 = sld [smem:[#allocation9_spill]] }
  0x2e   :  { %2425 = vset.pattern.permute.xlu1 %v2581_v0  ;;  %2424 = vset.pattern.permute.xlu0 %v2582_v1  ;;  %v2457_v5 = vld [vmem:[%s3121_s8] sm:$0xff]   ;;  %vm2584_vm0 = vmmov 0   ;;  %s3148_s0 = sld [smem:[#allocation10_spill]]  ;;  %vm240_vm1 = vcmask 130048   ;;  %s3149_s15 = sld [smem:[#allocation15_spill]]  ;;  %vm178_vm2 = vcmask 261120  }
  0x2f   :  { %2234 = vmatprep.subr.bf16.mxu1 %v2583_v2  ;;  %2226 = vmatprep.subr.bf16.mxu0 %v2583_v2  ;;  %s3150_s17 = sld [smem:[#allocation12_spill]]  ;;  %s3151_s29 = sld [smem:[#allocation11_spill]]  ;;  %v2064_v31 = vld [vmem:[%s3122_s9] ss:$0 sm:$0xff]  ;;  %vm493_vm3 = vcmask 64512   ;;  %vm548_vm4 = vcmask 1043456  }
  0x30   :  { %2236 = vmatprep.mubr.msk.bf16.mxu1 %vm2584_vm0, %v2583_v2  ;;  %2230 = vmatprep.mubr.msk.bf16.mxu0 %vm2584_vm0, %v2583_v2  ;;  %s3153_s5 = sld [smem:[#allocation14_spill]]  ;;  %v2060_v45 = vld [vmem:[%s3120_s7] ss:$0 sm:$0xff]  ;;  %s2586_s3 = smov 96   ;;  %vm974_vm5 = vcmask 523264  }
  0x31   :  { %2235 = vmatpush3.bf16.msra.mxu1 %v2457_v5 }
  0x32   :  { %2240 = vmatprep.subr.bf16.mxu1 %v2583_v2 }
  0x33   :  { %v113_v3 = vld [vmem:[%s3147_s27] sm:$0xff]  ;;  %v114_v4 = vld [vmem:[%s3147_s27 + $0x8] sm:$0xff]  ;;  %s2585_s27 = smov 112  }
  0x34   :  { %136 = vperm.xlu1 %2425, %v113_v3   ;;  %118 = vperm.xlu0 %2424, %v113_v3   ;;  %v151_v6 = vld [vmem:[%s3148_s0] sm:$0xff]  ;;  %v152_v7 = vld [vmem:[%s3148_s0 + $0x8] sm:$0xff]  ;;  %s3152_s0 = sld [smem:[#allocation13_spill]] }
  0x35   :  { %v2751_v8 = vpack.c.bf16 %v152_v7, %v151_v6  ;;  %v2458_v9 = vld [vmem:[%s3149_s15] sm:$0xff]   ;;  %v2459_v10 = vld [vmem:[%s3149_s15 + $0x8] sm:$0xff]   ;;  %v104_v11 = vstv %s3150_s17 }
  0x36   :  { %2227 = vmatpush3.bf16.msra.mxu0 %v2458_v9  ;;  %v103_v12 = vld [vmem:[%s3151_s29] sm:$0xff] }
  0x37   :  { %2237 = vmatmul.mubr.msk.bf16.vlgmr.msra.gmra.mrb[0].mxu1 %vm240_vm1, %v2751_v8  ;;  %2228 = vmatprep.subr.bf16.mxu0 %v2583_v2  ;;  %v105_v13 = vmul.f32 %v104_v11, %v103_v12  ;;  %v2057_v15 = vld [vmem:[%s3153_s5] ss:$0 sm:$0xff] }
  0x38   :  { %140 = vperm.xlu1 %2425, %v114_v4   ;;  %123 = vperm.xlu0 %2424, %v114_v4  }
  0x39   :  { %2242 = vmatprep.mubr.msk.bf16.mxu1 %vm2584_vm0, %v2583_v2  ;;  %v112_v18 = vadd.f32 %v2057_v15, %v105_v13 }
  0x3a   :  { %2229 = vmatpush3.bf16.msra.mxu0 %v2459_v10  ;;  %v2058_v14 = vld [vmem:[%s3152_s0] ss:$0 sm:$0xff]  ;;  %v2059_v20 = vld [vmem:[%s3152_s0 + $0x1] ss:$0 sm:$0xff] }
  0x3b   :  { %2246 = vmatprep.subr.bf16.mxu0 %v2583_v2 }
  0x3c   :  { %2456 = vset.pattern.permute.xlu0 %v2581_v0 }
  0xb3   :  { %v137_v16 = vpop.permute.xlu1 %136  ;;  %v119_v17 = vpop.permute.xlu0 %118 }
  0xb4   :  { %v130_v19 = vmul.f32 %v2058_v14, %v119_v17  ;;  %v147_v23 = vmul.f32 %v2059_v20, %v137_v16 }
  0xb6   :  { %v132_v24 = vadd.f32 %v130_v19, %v112_v18 }
  0xb7   :  { %v141_v21 = vpop.permute.xlu1 %140  ;;  %v124_v22 = vpop.permute.xlu0 %123 }
  0xb8   :  { %v131_v25 = vmul.f32 %v2058_v14, %v124_v22  ;;  %v148_v26 = vmul.f32 %v2059_v20, %v141_v21  ;;  %v2781_v28 = vadd.f32 %v147_v23, %v132_v24 }
  0xba   :  { %v133_v27 = vadd.f32 %v131_v25, %v112_v18 }
  0xbc   :  { %v2783_v29 = vadd.f32 %v148_v26, %v133_v27 }
  0xbe   :  { %v154_v30 = vpack.c.bf16 %v2783_v29, %v2781_v28 }
  0xc0   :  { %2231 = vmatmul.mubr.msk.bf16.vlgmr.msra.gmra.mrb[0].mxu0 %vm178_vm2, %v154_v30 }
  0xc1   :  { %2248 = vmatprep.mubr.msk.bf16.mxu0 %vm2584_vm0, %v2583_v2 }
 0x10a   :  { %v278_v32 = vpop.f32.mrb[0].mxu1 }
 0x10b   :  { %v279_v33 = vadd.f32 %v2064_v31, %v278_v32  ;;  %v2238_v34 = vpop.f32.mrb[1].mxu1 }
 0x10c   :  { %v281_v35 = vpop.f32.mrb[2].mxu1 }
 0x10d   :  { %v2793_v36 = vpack.c.bf16 %v279_v33, %v279_v33  ;;  %v282_v37 = vadd.f32 %v2064_v31, %v281_v35  ;;  %v2239_v38 = vpop.f32.mrb[3].mxu1 }
 0x10f   :  { %v2426_v39 = vpack.i.bf16 %v282_v37, %v279_v33  ;;  %v2795_v40 = vpack.c.bf16 %v282_v37, %v282_v37  ;;  %v313_v41 = vsel %vm240_vm1, %v2793_v36, 0 }
 0x110   :  { %2241 = vmatpush3.bf16.xpose.msra.mxu1 %v313_v41 }
 0x111   :  { %2427 = vrot.lane.b32.xlu0 %v2426_v39, %s2585_s27  ;;  %v359_v42 = vsel %vm240_vm1, %v2795_v40, 0  ;;  %2252 = vmatprep.subr.bf16.mxu1 %v2583_v2 }
 0x112   :  { %2247 = vmatpush3.bf16.xpose.msra.mxu0 %v359_v42 }
 0x113   :  { %2258 = vmatprep.subr.bf16.mxu0 %v2583_v2 }
 0x183   :  { %v2428_v43 = vpop.permute.xlu0 %2427 }
 0x184   :  { %v2429_v44 = vunpack.i.l.bf16 %v2428_v43  ;;  %v2430_v46 = vunpack.i.h.bf16 %v2428_v43 }
 0x186   :  { %v2807_v50 = vpack.c.bf16 %v2429_v44, %v2429_v44  ;;  %v2809_v55 = vpack.c.bf16 %v2430_v46, %v2430_v46 }
 0x188   :  { %v405_v58 = vsel %vm240_vm1, %v2807_v50, 0  ;;  %v451_v61 = vsel %vm240_vm1, %v2809_v55, 0 }
 0x193   :  { %v216_v47 = vpop.f32.mrb[0].mxu0 }
 0x194   :  { %v217_v48 = vadd.f32 %v2060_v45, %v216_v47  ;;  %v2232_v49 = vpop.f32.mrb[1].mxu0 }
 0x195   :  { %v219_v51 = vpop.f32.mrb[2].mxu0 }
 0x196   :  { %v223_v52 = vmul.f32 0.25, %v217_v48  ;;  %v220_v53 = vadd.f32 %v2060_v45, %v219_v51  ;;  %v2233_v54 = vpop.f32.mrb[3].mxu0 }
 0x198   :  { %v293_v56 = vpack.c.bf16 %v223_v52, %v223_v52  ;;  %v224_v57 = vmul.f32 0.25, %v220_v53 }
 0x19a   :  { %v2431_v59 = vpack.i.bf16 %v224_v57, %v223_v52  ;;  %v294_v60 = vpack.c.bf16 %v224_v57, %v224_v57  ;;  %2243 = vmatmul.mubr.msk.bf16.vlgmr.msra.gmra.mrb[4].mxu1 %vm240_vm1, %v293_v56 }
 0x19b   :  { %2253 = vmatpush3.bf16.xpose.msra.mxu1 %v405_v58  ;;  %2254 = vmatprep.mubr.msk.bf16.mxu1 %vm2584_vm0, %v2583_v2 }
 0x19c   :  { %2432 = vrot.lane.b32.xlu1 %v2431_v59, %s2585_s27  ;;  %2249 = vmatmul.mubr.msk.bf16.vlgmr.msra.gmra.mrb[4].mxu0 %vm240_vm1, %v294_v60 }
 0x19d   :  { %2259 = vmatpush3.bf16.xpose.msra.mxu0 %v451_v61  ;;  %2260 = vmatprep.mubr.msk.bf16.mxu0 %vm2584_vm0, %v2583_v2 }
 0x19e   :  { %2264 = vmatprep.subr.bf16.mxu1 %v2583_v2  ;;  %2270 = vmatprep.subr.bf16.mxu0 %v2583_v2 }
 0x20e   :  { %v2433_v62 = vpop.permute.xlu1 %2432 }
 0x20f   :  { %v2435_v63 = vunpack.i.h.bf16 %v2433_v62  ;;  %v2434_v0 = vunpack.i.l.bf16 %v2433_v62 }
 0x211   :  { %v296_v1 = vpack.c.bf16 %v2435_v63, %v2435_v63  ;;  %v295_v3 = vpack.c.bf16 %v2434_v0, %v2434_v0 }
 0x213   :  { %2255 = vmatmul.mubr.msk.bf16.vlgmr.msra.gmra.mrb[8].mxu1 %vm240_vm1, %v295_v3  ;;  %2261 = vmatmul.mubr.msk.bf16.vlgmr.msra.gmra.mrb[8].mxu0 %vm240_vm1, %v296_v1 }
 0x214   :  { %2266 = vmatprep.mubr.msk.bf16.mxu1 %vm2584_vm0, %v2583_v2  ;;  %2272 = vmatprep.mubr.msk.bf16.mxu0 %vm2584_vm0, %v2583_v2 }
 0x26d   :  { %v349_v4 = vpop.f32.mrb[4].mxu1 }
 0x26e   :  { %v2244_v5 = vpop.f32.mrb[5].mxu1  ;;  %v494_v6 = vsel %vm493_vm3, %v349_v4, -inf }
 0x26f   :  { %495 = vmax.xlane.f32.xlu0 %v494_v6  ;;  %v352_v7 = vpop.f32.mrb[6].mxu1  ;;  %v395_v9 = vpop.f32.mrb[4].mxu0 }
 0x270   :  { %v2245_v10 = vpop.f32.mrb[7].mxu1  ;;  %v2250_v11 = vpop.f32.mrb[5].mxu0  ;;  %v497_v12 = vsel %vm493_vm3, %v395_v9, -inf }
 0x271   :  { %498 = vmax.xlane.f32.xlu1 %v497_v12  ;;  %v398_v13 = vpop.f32.mrb[6].mxu0  ;;  %v2460_v11 = vld [vmem:[%s3123_s10] sm:$0xff]  }
 0x272   :  { %v2251_v14 = vpop.f32.mrb[7].mxu0 }
 0x273   :  { %v2461_v14 = vld [vmem:[%s3123_s10 + $0x8] sm:$0xff]  }
 0x282   :  { %543 = vrot.lane.b32.xlu1 %v2793_v36, %s2586_s3 }
 0x2e6   :  { %v441_v15 = vpop.f32.mrb[8].mxu1  ;;  %v487_v16 = vpop.f32.mrb[8].mxu0 }
 0x2e7   :  { %v2256_v17 = vpop.f32.mrb[9].mxu1  ;;  %v2262_v18 = vpop.f32.mrb[9].mxu0  ;;  %v500_v19 = vsel %vm493_vm3, %v441_v15, -inf  ;;  %v503_v24 = vsel %vm493_vm3, %v487_v16, -inf }
 0x2e8   :  { %501 = vmax.xlane.f32.xlu0 %v500_v19  ;;  %v444_v20 = vpop.f32.mrb[10].mxu1  ;;  %v490_v21 = vpop.f32.mrb[10].mxu0 }
 0x2e9   :  { %v2257_v22 = vpop.f32.mrb[11].mxu1  ;;  %v2263_v23 = vpop.f32.mrb[11].mxu0 }
 0x2ec   :  { %504 = vmax.xlane.f32.xlu0 %v503_v24 }
 0x2fc   :  { %v496_v25 = vpop.xlane.xlu0 %495 }
 0x2fd   :  { %v506_v26 = vsub.f32 %v349_v4, %v496_v25 }
 0x2fe   :  { %v499_v27 = vpop.xlane.xlu1 %498 }
 0x2ff   :  { %v510_v30 = vmul.f32 1.442695, %v506_v26  ;;  %v507_v31 = vsub.f32 %v395_v9, %v499_v27 }
 0x301   :  { %2481 = vpow2.f32 %v510_v30  ;;  %v512_v32 = vmul.f32 1.442695, %v507_v31 }
 0x302   :  { %v544_v33 = vpop.permute.xlu1 %543 }
 0x303   :  { %2483 = vpow2.f32 %v512_v32  ;;  %v550_v34 = vsel %vm548_vm4, %v544_v33, 0 }
 0x304   :  { %2265 = vmatpush3.bf16.msra.mxu1 %v550_v34 }
 0x305   :  { %2276 = vmatprep.subr.bf16.mxu1 %v2583_v2 }
 0x30b   :  { %v2482_v35 = vpop.eup %2481 }
 0x30c   :  { %v518_v36 = vsel %vm493_vm3, %v2482_v35, 0.0 }
 0x30d   :  { %v2484_v37 = vpop.eup %2483  ;;  %519 = vadd.xlane.f32.xlu1 %v518_v36  ;;  %v2075_v36 = vld [vmem:[%s3124_s11] ss:$0 sm:$0xff] }
 0x30e   :  { %v521_v38 = vsel %vm493_vm3, %v2484_v37, 0.0 }
 0x30f   :  { %522 = vadd.xlane.f32.xlu0 %v521_v38 }
 0x375   :  { %v502_v39 = vpop.xlane.xlu0 %501 }
 0x376   :  { %v508_v41 = vsub.f32 %v441_v15, %v502_v39 }
 0x378   :  { %v514_v42 = vmul.f32 1.442695, %v508_v41 }
 0x379   :  { %v505_v43 = vpop.xlane.xlu0 %504 }
 0x37a   :  { %2485 = vpow2.f32 %v514_v42  ;;  %v509_v44 = vsub.f32 %v487_v16, %v505_v43 }
 0x37c   :  { %v516_v45 = vmul.f32 1.442695, %v509_v44 }
 0x37e   :  { %2487 = vpow2.f32 %v516_v45 }
 0x384   :  { %v2486_v46 = vpop.eup %2485 }
 0x385   :  { %v524_v47 = vsel %vm493_vm3, %v2486_v46, 0.0 }
 0x386   :  { %525 = vadd.xlane.f32.xlu1 %v524_v47 }
 0x388   :  { %v2488_v48 = vpop.eup %2487 }
 0x389   :  { %v527_v49 = vsel %vm493_vm3, %v2488_v48, 0.0 }
 0x38a   :  { %528 = vadd.xlane.f32.xlu0 %v527_v49 }
 0x397   :  { %642 = vrot.lane.b32.xlu1 %v2807_v50, %s2586_s3 }
 0x39a   :  { %v520_v51 = vpop.xlane.xlu1 %519 }
 0x39b   :  { %2489 = vrcp.f32 %v520_v51  ;;  %691 = vrot.lane.b32.xlu1 %v2809_v55, %s2586_s3 }
 0x39c   :  { %v523_v56 = vpop.xlane.xlu0 %522 }
 0x39d   :  { %2491 = vrcp.f32 %v523_v56 }
 0x3a0   :  { %593 = vrot.lane.b32.xlu0 %v2795_v40, %s2586_s3 }
 0x3a5   :  { %v2490_v52 = vpop.eup %2489 }
 0x3a6   :  { %v531_v53 = vmul.f32 %v2490_v52, %v2482_v35 }
 0x3a7   :  { %v2492_v50 = vpop.eup %2491 }
 0x3a8   :  { %v538_v54 = vpack.c.bf16 %v531_v53, %v531_v53  ;;  %v533_v40 = vmul.f32 %v2492_v50, %v2484_v37 }
 0x3aa   :  { %2267 = vmatmul.mubr.msk.bf16.vlgmr.msra.gmra.mrb[12].mxu1 %vm493_vm3, %v538_v54  ;;  %v539_v0 = vpack.c.bf16 %v533_v40, %v533_v40 }
 0x3ab   :  { %2278 = vmatprep.mubr.msk.bf16.mxu1 %vm2584_vm0, %v2583_v2 }
 0x413   :  { %v526_v57 = vpop.xlane.xlu1 %525 }
 0x414   :  { %2493 = vrcp.f32 %v526_v57 }
 0x417   :  { %v643_v58 = vpop.permute.xlu1 %642  ;;  %v529_v59 = vpop.xlane.xlu0 %528 }
 0x418   :  { %v648_v55 = vsel %vm548_vm4, %v643_v58, 0  ;;  %2495 = vrcp.f32 %v529_v59  ;;  %v2463_v58 = vld [vmem:[%s3127_s14 + $0x8] sm:$0xff]   ;;  %v2464_v59 = vld [vmem:[%s3129_s16] sm:$0xff]  }
 0x419   :  { %2277 = vmatpush3.bf16.msra.mxu1 %v648_v55  ;;  %v2465_v55 = vld [vmem:[%s3129_s16 + $0x8] sm:$0xff]  }
 0x41a   :  { %2288 = vmatprep.subr.bf16.mxu1 %v2583_v2 }
 0x41b   :  { %v594_v60 = vpop.permute.xlu0 %593  ;;  %v692_v62 = vpop.permute.xlu1 %691 }
 0x41c   :  { %v599_v61 = vsel %vm548_vm4, %v594_v60, 0  ;;  %v697_v3 = vsel %vm548_vm4, %v692_v62, 0 }
 0x41d   :  { %2271 = vmatpush3.bf16.msra.mxu0 %v599_v61 }
 0x41e   :  { %v2494_v63 = vpop.eup %2493  ;;  %2282 = vmatprep.subr.bf16.mxu0 %v2583_v2 }
 0x41f   :  { %v535_v1 = vmul.f32 %v2494_v63, %v2486_v46 }
 0x420   :  { %2273 = vmatmul.mubr.msk.bf16.vlgmr.msra.gmra.mrb[12].mxu0 %vm493_vm3, %v539_v0 }
 0x421   :  { %2283 = vmatpush3.bf16.msra.mxu0 %v697_v3  ;;  %v540_v4 = vpack.c.bf16 %v535_v1, %v535_v1  ;;  %2284 = vmatprep.mubr.msk.bf16.mxu0 %vm2584_vm0, %v2583_v2  ;;  %v2079_v3 = vld [vmem:[%s3125_s12] ss:$0 sm:$0xff] }
 0x422   :  { %v2496_v5 = vpop.eup %2495  ;;  %2296 = vmatprep.subr.bf16.mxu0 %v2583_v2 }
 0x423   :  { %v537_v6 = vmul.f32 %v2496_v5, %v2488_v48  ;;  %2279 = vmatmul.mubr.msk.bf16.vlgmr.msra.gmra.mrb[16].mxu1 %vm493_vm3, %v540_v4 }
 0x424   :  { %2292 = vmatprep.mubr.msk.bf16.mxu1 %vm2584_vm0, %v2583_v2  ;;  %2289 = vmatpush3.bf16.msra.mxu1 %v2460_v11 }
 0x425   :  { %v541_v7 = vpack.c.bf16 %v537_v6, %v537_v6  ;;  %2290 = vmatprep.subr.bf16.mxu1 %v2583_v2 }
 0x428   :  { %2285 = vmatmul.mubr.msk.bf16.vlgmr.msra.gmra.mrb[16].mxu0 %vm493_vm3, %v541_v7  ;;  %2291 = vmatpush3.bf16.msra.mxu1 %v2461_v14  ;;  %v2466_v14 = vld [vmem:[%s3129_s16 + $0x10] sm:$0xff]  }
 0x429   :  { %2300 = vmatprep.mubr.msk.bf16.mxu0 %vm2584_vm0, %v2583_v2  ;;  %2304 = vmatprep.subr.bf16.mxu1 %v2583_v2 }
 0x47d   :  { %v586_v9 = vpop.f32.mrb[12].mxu1 }
 0x47e   :  { %v2268_v10 = vpop.f32.mrb[13].mxu1 }
 0x47f   :  { %v589_v12 = vpop.f32.mrb[14].mxu1 }
 0x480   :  { %v2269_v13 = vpop.f32.mrb[15].mxu1 }
 0x4f3   :  { %v635_v15 = vpop.f32.mrb[12].mxu0 }
 0x4f4   :  { %v2274_v16 = vpop.f32.mrb[13].mxu0 }
 0x4f5   :  { %v638_v17 = vpop.f32.mrb[14].mxu0  ;;  %v2081_v16 = vld [vmem:[#allocation3] ss:$0 sm:$0xff] }
 0x4f6   :  { %v2275_v18 = vpop.f32.mrb[15].mxu0  ;;  %v684_v19 = vpop.f32.mrb[16].mxu1 }
 0x4f7   :  { %v2280_v20 = vpop.f32.mrb[17].mxu1 }
 0x4f8   :  { %v687_v21 = vpop.f32.mrb[18].mxu1 }
 0x4f9   :  { %v2281_v22 = vpop.f32.mrb[19].mxu1 }
 0x4fb   :  { %v733_v23 = vpop.f32.mrb[16].mxu0 }
 0x4fc   :  { %v2436_v24 = vpack.i.bf16 %v733_v23, %v684_v19  ;;  %v2286_v25 = vpop.f32.mrb[17].mxu0 }
 0x4fd   :  { %v736_v26 = vpop.f32.mrb[18].mxu0 }
 0x4fe   :  { %2437 = vrot.lane.b32.xlu0 %v2436_v24, %s2578_s6  ;;  %v2287_v27 = vpop.f32.mrb[19].mxu0  ;;  %v2085_v26 = vld [vmem:[#allocation5] ss:$0 sm:$0xff] }
 0x570   :  { %v2438_v30 = vpop.permute.xlu0 %2437 }
 0x571   :  { %v2440_v31 = vunpack.i.h.bf16 %v2438_v30  ;;  %v2439_v32 = vunpack.i.l.bf16 %v2438_v30 }
 0x573   :  { %v748_v33 = vsel %vm240_vm1, %v635_v15, %v2440_v31  ;;  %v747_v34 = vsel %vm240_vm1, %v586_v9, %v2439_v32  ;;  %v2080_v9 = vld [vmem:[%s3126_s13] ss:$0 sm:$0xff]  ;;  %v2467_v15 = vld [vmem:[%s3129_s16 + $0x18] sm:$0xff]  }
 0x574   :  { %v749_v35 = vpack.c.bf16 %v748_v33, %v747_v34 }
 0x576   :  { %2293 = vmatmul.mubr.msk.bf16.vlgmr.msra.gmra.mrb[20].mxu1 %vm178_vm2, %v749_v35 }
 0x577   :  { %2312 = vmatprep.mubr.msk.bf16.mxu1 %vm2584_vm0, %v2583_v2  ;;  %2305 = vmatpush3.bf16.msra.mxu1 %v2464_v59 }
 0x578   :  { %2306 = vmatprep.subr.bf16.mxu1 %v2583_v2 }
 0x57b   :  { %2307 = vmatpush3.bf16.msra.mxu1 %v2465_v55 }
 0x57c   :  { %2308 = vmatprep.subr.bf16.mxu1 %v2583_v2 }
 0x57f   :  { %2309 = vmatpush3.bf16.msra.mxu1 %v2466_v14  ;;  %v2105_v14 = vld [vmem:[%s3122_s9 + $0x1] ss:$0 sm:$0xff] }
 0x580   :  { %2310 = vmatprep.subr.bf16.mxu1 %v2583_v2 }
 0x583   :  { %2311 = vmatpush3.bf16.msra.mxu1 %v2467_v15 }
 0x584   :  { %2330 = vmatprep.subr.bf16.mxu1 %v2583_v2 }
 0x649   :  { %v810_v37 = vpop.f32.mrb[20].mxu1 }
 0x64a   :  { %v811_v38 = vadd.f32 %v2075_v36, %v810_v37  ;;  %v2294_v39 = vpop.f32.mrb[21].mxu1 }
 0x64b   :  { %v813_v41 = vpop.f32.mrb[22].mxu1 }
 0x64c   :  { %v814_v42 = vadd.f32 %v2075_v36, %v813_v41  ;;  %v2295_v43 = vpop.f32.mrb[23].mxu1  ;;  %v817_v44 = vadd.f32 %v811_v38, %v2781_v28 }
 0x64e   :  { %v821_v45 = vsel %vm178_vm2, %v817_v44, 0.0  ;;  %v818_v46 = vadd.f32 %v814_v42, %v2783_v29  ;;  %v2462_v29 = vld [vmem:[%s3127_s14] sm:$0xff]  }
 0x64f   :  { %822 = vadd.xlane.f32.xlu1 %v821_v45  ;;  %2297 = vmatpush3.bf16.msra.mxu0 %v2462_v29 }
 0x650   :  { %v824_v47 = vsel %vm178_vm2, %v818_v46, 0.0  ;;  %2298 = vmatprep.subr.bf16.mxu0 %v2583_v2 }
 0x651   :  { %825 = vadd.xlane.f32.xlu0 %v824_v47 }
 0x653   :  { %2299 = vmatpush3.bf16.msra.mxu0 %v2463_v58  ;;  %v2091_v58 = vld [vmem:[%s3131_s18] ss:$0 sm:$0xff] }
 0x654   :  { %2316 = vmatprep.subr.bf16.mxu0 %v2583_v2 }
 0x6dc   :  { %v823_v48 = vpop.xlane.xlu1 %822 }
 0x6dd   :  { %v828_v49 = vmul.f32 0.03125, %v823_v48 }
 0x6de   :  { %v826_v51 = vpop.xlane.xlu0 %825 }
 0x6df   :  { %v830_v52 = vsub.f32 %v817_v44, %v828_v49  ;;  %v829_v53 = vmul.f32 0.03125, %v826_v51  ;;  %v2468_v51 = vld [vmem:[%s3149_s15 + $0x10] sm:$0xff]  }
 0x6e1   :  { %v831_v54 = vsub.f32 %v818_v46, %v829_v53  ;;  %v832_v56 = vmul.f32 %v830_v52, %v830_v52 }
 0x6e3   :  { %v834_v57 = vsel %vm178_vm2, %v832_v56, 0.0  ;;  %v833_v50 = vmul.f32 %v831_v54, %v831_v54 }
 0x6e4   :  { %835 = vadd.xlane.f32.xlu0 %v834_v57 }
 0x6e5   :  { %v837_v28 = vsel %vm178_vm2, %v833_v50, 0.0 }
 0x6e6   :  { %838 = vadd.xlane.f32.xlu1 %v837_v28 }
 0x771   :  { %v836_v40 = vpop.xlane.xlu0 %835 }
 0x772   :  { %v840_v60 = vmul.f32 0.03125, %v836_v40 }
 0x773   :  { %v839_v61 = vpop.xlane.xlu1 %838 }
 0x774   :  { %v842_v62 = vadd.f32 1e-05, %v840_v60  ;;  %v841_v63 = vmul.f32 0.03125, %v839_v61  ;;  %v2092_v61 = vld [vmem:[%s3132_s19] ss:$0 sm:$0xff] }
 0x776   :  { %2497 = vrsqrt.f32 %v842_v62  ;;  %v843_v0 = vadd.f32 1e-05, %v841_v63 }
 0x778   :  { %2499 = vrsqrt.f32 %v843_v0 }
 0x780   :  { %v2498_v1 = vpop.eup %2497 }
 0x781   :  { %v846_v4 = vmul.f32 %v2498_v1, %v830_v52  ;;  %v2469_v52 = vld [vmem:[%s3149_s15 + $0x18] sm:$0xff]   ;;  %v2470_v1 = vld [vmem:[%s3121_s8 + $0x8] sm:$0xff]  }
 0x782   :  { %v2500_v5 = vpop.eup %2499 }
 0x783   :  { %v854_v6 = vmul.f32 %v2079_v3, %v846_v4  ;;  %v847_v7 = vmul.f32 %v2500_v5, %v831_v54  ;;  %v2098_v4 = vld [vmem:[%s3120_s7 + $0x1] ss:$0 sm:$0xff] }
 0x785   :  { %v855_v10 = vmul.f32 %v2079_v3, %v847_v7  ;;  %v862_v11 = vadd.f32 %v2080_v9, %v854_v6 }
 0x787   :  { %v863_v12 = vadd.f32 %v2080_v9, %v855_v10 }
 0x789   :  { %v864_v13 = vpack.c.bf16 %v863_v12, %v862_v11 }
 0x78b   :  { %2301 = vmatmul.mubr.msk.bf16.vlgmr.msra.gmra.mrb[20].mxu0 %vm178_vm2, %v864_v13 }
 0x78c   :  { %2320 = vmatprep.mubr.msk.bf16.mxu0 %vm2584_vm0, %v2583_v2  ;;  %2317 = vmatpush3.bf16.msra.mxu0 %v2468_v51 }
 0x78d   :  { %2318 = vmatprep.subr.bf16.mxu0 %v2583_v2 }
 0x790   :  { %2319 = vmatpush3.bf16.msra.mxu0 %v2469_v52 }
 0x791   :  { %2324 = vmatprep.subr.bf16.mxu0 %v2583_v2 }
 0x85e   :  { %v925_v17 = vpop.f32.mrb[20].mxu0 }
 0x85f   :  { %v926_v18 = vadd.f32 %v2081_v16, %v925_v17  ;;  %v2302_v19 = vpop.f32.mrb[21].mxu0 }
 0x860   :  { %v928_v20 = vpop.f32.mrb[22].mxu0 }
 0x861   :  { %v929_v21 = vadd.f32 %v2081_v16, %v928_v20  ;;  %v2303_v22 = vpop.f32.mrb[23].mxu0  ;;  %v932_v23 = vmax.f32 %v926_v18, 0.0 }
 0x863   :  { %v933_v24 = vmax.f32 %v929_v21, 0.0 }
 0x865   :  { %v934_v25 = vpack.c.bf16 %v933_v24, %v932_v23 }
 0x867   :  { %2313 = vmatmul.mubr.msk.bf16.vlgmr.msra.gmra.mrb[24].mxu1 %vm974_vm5, %v934_v25 }
 0x868   :  { %2332 = vmatprep.mubr.msk.bf16.mxu1 %vm2584_vm0, %v2583_v2 }
 0x93a   :  { %v1012_v27 = vpop.f32.mrb[24].mxu1 }
 0x93b   :  { %v1013_v30 = vadd.f32 %v2085_v26, %v1012_v27  ;;  %v2314_v31 = vpop.f32.mrb[25].mxu1 }
 0x93c   :  { %v1015_v32 = vpop.f32.mrb[26].mxu1 }
 0x93d   :  { %v1016_v33 = vadd.f32 %v2085_v26, %v1015_v32  ;;  %v2315_v34 = vpop.f32.mrb[27].mxu1  ;;  %v1019_v35 = vadd.f32 %v1013_v30, %v862_v11 }
 0x93f   :  { %v1023_v36 = vsel %vm178_vm2, %v1019_v35, 0.0  ;;  %v1020_v37 = vadd.f32 %v1016_v33, %v863_v12 }
 0x940   :  { %1024 = vadd.xlane.f32.xlu0 %v1023_v36 }
 0x941   :  { %v1026_v38 = vsel %vm178_vm2, %v1020_v37, 0.0 }
 0x942   :  { %1027 = vadd.xlane.f32.xlu1 %v1026_v38 }
 0x9cd   :  { %v1025_v39 = vpop.xlane.xlu0 %1024 }
 0x9ce   :  { %v1029_v41 = vmul.f32 0.03125, %v1025_v39 }
 0x9cf   :  { %v1028_v42 = vpop.xlane.xlu1 %1027 }
 0x9d0   :  { %v1031_v43 = vsub.f32 %v1019_v35, %v1029_v41  ;;  %v1030_v44 = vmul.f32 0.03125, %v1028_v42 }
 0x9d2   :  { %v1032_v45 = vsub.f32 %v1020_v37, %v1030_v44  ;;  %v1033_v46 = vmul.f32 %v1031_v43, %v1031_v43 }
 0x9d4   :  { %v1035_v47 = vsel %vm178_vm2, %v1033_v46, 0.0  ;;  %v1034_v48 = vmul.f32 %v1032_v45, %v1032_v45 }
 0x9d5   :  { %1036 = vadd.xlane.f32.xlu0 %v1035_v47 }
 0x9d6   :  { %v1038_v49 = vsel %vm178_vm2, %v1034_v48, 0.0 }
 0x9d7   :  { %1039 = vadd.xlane.f32.xlu1 %v1038_v49 }
 0xa62   :  { %v1037_v53 = vpop.xlane.xlu0 %1036 }
 0xa63   :  { %v1041_v54 = vmul.f32 0.03125, %v1037_v53 }
 0xa64   :  { %v1040_v56 = vpop.xlane.xlu1 %1039 }
 0xa65   :  { %v1043_v57 = vadd.f32 1e-05, %v1041_v54  ;;  %v1042_v50 = vmul.f32 0.03125, %v1040_v56 }
 0xa67   :  { %2501 = vrsqrt.f32 %v1043_v57  ;;  %v1044_v28 = vadd.f32 1e-05, %v1042_v50 }
 0xa69   :  { %2503 = vrsqrt.f32 %v1044_v28 }
 0xa71   :  { %v2502_v29 = vpop.eup %2501 }
 0xa72   :  { %v1047_v59 = vmul.f32 %v2502_v29, %v1031_v43 }
 0xa73   :  { %v2504_v55 = vpop.eup %2503 }
 0xa74   :  { %v1055_v40 = vmul.f32 %v2091_v58, %v1047_v59  ;;  %v1048_v60 = vmul.f32 %v2504_v55, %v1032_v45 }
 0xa76   :  { %v1056_v62 = vmul.f32 %v2091_v58, %v1048_v60  ;;  %v2943_v63 = vadd.f32 %v2092_v61, %v1055_v40 }
 0xa78   :  { %v2945_v0 = vadd.f32 %v2092_v61, %v1056_v62 }
 0xa7a   :  { %v1065_v3 = vpack.c.bf16 %v2945_v0, %v2943_v63 }
 0xa7c   :  { %2321 = vmatmul.mubr.msk.bf16.vlgmr.msra.gmra.mrb[24].mxu0 %vm178_vm2, %v1065_v3 }
 0xa7d   :  { %2325 = vmatpush3.bf16.msra.mxu0 %v2470_v1  ;;  %2326 = vmatprep.mubr.msk.bf16.mxu0 %vm2584_vm0, %v2583_v2 }
 0xa7e   :  { %2336 = vmatprep.subr.bf16.mxu0 %v2583_v2 }
 0xa84   :  { %2327 = vmatmul.mubr.msk.bf16.vlgmr.msra.gmra.mrb[28].mxu0 %vm240_vm1, %v2751_v8 }
 0xa85   :  { %2338 = vmatprep.mubr.msk.bf16.mxu0 %vm2584_vm0, %v2583_v2 }
 0xb4f   :  { %v1128_v5 = vpop.f32.mrb[24].mxu0 }
 0xb50   :  { %v1129_v6 = vadd.f32 %v2098_v4, %v1128_v5  ;;  %v2322_v7 = vpop.f32.mrb[25].mxu0 }
 0xb51   :  { %v1131_v9 = vpop.f32.mrb[26].mxu0 }
 0xb52   :  { %v1132_v10 = vadd.f32 %v2098_v4, %v1131_v9  ;;  %v2323_v11 = vpop.f32.mrb[27].mxu0  ;;  %v1135_v12 = vmul.f32 0.25, %v1129_v6 }
 0xb54   :  { %v1136_v13 = vmul.f32 0.25, %v1132_v10  ;;  %v1203_v26 = vpack.c.bf16 %v1135_v12, %v1135_v12 }
 0xb56   :  { %v2446_v8 = vpack.i.bf16 %v1136_v13, %v1135_v12  ;;  %v1204_v27 = vpack.c.bf16 %v1136_v13, %v1136_v13 }
 0xb57   :  { %v1188_v15 = vpop.f32.mrb[28].mxu0 }
 0xb58   :  { %v1189_v16 = vadd.f32 %v2105_v14, %v1188_v15  ;;  %2447 = vrot.lane.b32.xlu1 %v2446_v8, %s2585_s27  ;;  %v2328_v17 = vpop.f32.mrb[29].mxu0 }
 0xb59   :  { %v1191_v18 = vpop.f32.mrb[30].mxu0 }
 0xb5a   :  { %v1215_v19 = vpack.c.bf16 %v1189_v16, %v1189_v16  ;;  %v1192_v20 = vadd.f32 %v2105_v14, %v1191_v18  ;;  %v2329_v21 = vpop.f32.mrb[31].mxu0 }
 0xb5c   :  { %v2441_v22 = vpack.i.bf16 %v1192_v20, %v1189_v16  ;;  %v1216_v23 = vpack.c.bf16 %v1192_v20, %v1192_v20  ;;  %v1223_v24 = vsel %vm240_vm1, %v1215_v19, 0 }
 0xb5d   :  { %2331 = vmatpush3.bf16.xpose.msra.mxu1 %v1223_v24 }
 0xb5e   :  { %2442 = vrot.lane.b32.xlu0 %v2441_v22, %s2585_s27  ;;  %v1269_v25 = vsel %vm240_vm1, %v1216_v23, 0  ;;  %2342 = vmatprep.subr.bf16.mxu1 %v2583_v2 }
 0xb5f   :  { %2337 = vmatpush3.bf16.xpose.msra.mxu0 %v1269_v25 }
 0xb60   :  { %2348 = vmatprep.subr.bf16.mxu0 %v2583_v2 }
 0xb64   :  { %2333 = vmatmul.mubr.msk.bf16.vlgmr.msra.gmra.mrb[28].mxu1 %vm240_vm1, %v1203_v26 }
 0xb65   :  { %2344 = vmatprep.mubr.msk.bf16.mxu1 %vm2584_vm0, %v2583_v2 }
 0xb66   :  { %2339 = vmatmul.mubr.msk.bf16.vlgmr.msra.gmra.mrb[32].mxu0 %vm240_vm1, %v1204_v27 }
 0xb67   :  { %2350 = vmatprep.mubr.msk.bf16.mxu0 %vm2584_vm0, %v2583_v2 }
 0xbca   :  { %v2448_v35 = vpop.permute.xlu1 %2447 }
 0xbcb   :  { %v2450_v38 = vunpack.i.h.bf16 %v2448_v35  ;;  %v2449_v39 = vunpack.i.l.bf16 %v2448_v35 }
 0xbcd   :  { %v1206_v41 = vpack.c.bf16 %v2450_v38, %v2450_v38  ;;  %v1205_v42 = vpack.c.bf16 %v2449_v39, %v2449_v39 }
 0xbd0   :  { %v2443_v30 = vpop.permute.xlu0 %2442 }
 0xbd1   :  { %v2445_v31 = vunpack.i.h.bf16 %v2443_v30  ;;  %v2444_v32 = vunpack.i.l.bf16 %v2443_v30 }
 0xbd3   :  { %v2978_v33 = vpack.c.bf16 %v2445_v31, %v2445_v31  ;;  %v2980_v34 = vpack.c.bf16 %v2444_v32, %v2444_v32 }
 0xbd5   :  { %v1315_v36 = vsel %vm240_vm1, %v2980_v34, 0  ;;  %v1361_v37 = vsel %vm240_vm1, %v2978_v33, 0 }
 0xbd6   :  { %2343 = vmatpush3.bf16.xpose.msra.mxu1 %v1315_v36  ;;  %2349 = vmatpush3.bf16.xpose.msra.mxu0 %v1361_v37 }
 0xbd7   :  { %2354 = vmatprep.subr.bf16.mxu1 %v2583_v2  ;;  %2360 = vmatprep.subr.bf16.mxu0 %v2583_v2 }
 0xbdd   :  { %2345 = vmatmul.mubr.msk.bf16.vlgmr.msra.gmra.mrb[32].mxu1 %vm240_vm1, %v1205_v42  ;;  %2351 = vmatmul.mubr.msk.bf16.vlgmr.msra.gmra.mrb[36].mxu0 %vm240_vm1, %v1206_v41 }
 0xbde   :  { %2356 = vmatprep.mubr.msk.bf16.mxu1 %vm2584_vm0, %v2583_v2  ;;  %2362 = vmatprep.mubr.msk.bf16.mxu0 %vm2584_vm0, %v2583_v2 }
 0xc37   :  { %v1259_v43 = vpop.f32.mrb[28].mxu1 }
 0xc38   :  { %v2334_v44 = vpop.f32.mrb[29].mxu1  ;;  %v1403_v45 = vsel %vm493_vm3, %v1259_v43, -inf }
 0xc39   :  { %1404 = vmax.xlane.f32.xlu1 %v1403_v45  ;;  %v1262_v46 = vpop.f32.mrb[30].mxu1  ;;  %v1305_v47 = vpop.f32.mrb[32].mxu0 }
 0xc3a   :  { %v2335_v48 = vpop.f32.mrb[31].mxu1  ;;  %v2340_v49 = vpop.f32.mrb[33].mxu0  ;;  %v1406_v51 = vsel %vm493_vm3, %v1305_v47, -inf  ;;  %v2471_v46 = vld [vmem:[%s3123_s10 + $0x10] sm:$0xff]  }
 0xc3b   :  { %1407 = vmax.xlane.f32.xlu0 %v1406_v51  ;;  %v1308_v52 = vpop.f32.mrb[34].mxu0 }
 0xc3c   :  { %v2341_v53 = vpop.f32.mrb[35].mxu0 }
 0xcb0   :  { %v1351_v54 = vpop.f32.mrb[32].mxu1  ;;  %v1397_v56 = vpop.f32.mrb[36].mxu0 }
 0xcb1   :  { %v2346_v57 = vpop.f32.mrb[33].mxu1  ;;  %v2352_v50 = vpop.f32.mrb[37].mxu0  ;;  %v1409_v28 = vsel %vm493_vm3, %v1351_v54, -inf  ;;  %v1412_v29 = vsel %vm493_vm3, %v1397_v56, -inf }
 0xcb2   :  { %v1354_v58 = vpop.f32.mrb[34].mxu1  ;;  %1410 = vmax.xlane.f32.xlu0 %v1409_v28  ;;  %1413 = vmax.xlane.f32.xlu1 %v1412_v29  ;;  %v1400_v59 = vpop.f32.mrb[38].mxu0  ;;  %v2472_v57 = vld [vmem:[%s3123_s10 + $0x18] sm:$0xff]  }
 0xcb3   :  { %v2347_v55 = vpop.f32.mrb[35].mxu1  ;;  %v2353_v40 = vpop.f32.mrb[39].mxu0 }
 0xcc3   :  { %1501 = vrot.lane.b32.xlu1 %v1216_v23, %s2586_s3 }
 0xcc6   :  { %v1405_v60 = vpop.xlane.xlu1 %1404 }
 0xcc7   :  { %v1415_v62 = vsub.f32 %v1259_v43, %v1405_v60 }
 0xcc8   :  { %1452 = vrot.lane.b32.xlu0 %v1215_v19, %s2586_s3  ;;  %v1408_v61 = vpop.xlane.xlu0 %1407 }
 0xcc9   :  { %v1416_v1 = vsub.f32 %v1305_v47, %v1408_v61  ;;  %v1419_v3 = vmul.f32 1.442695, %v1415_v62 }
 0xccb   :  { %v1421_v4 = vmul.f32 1.442695, %v1416_v1  ;;  %2505 = vpow2.f32 %v1419_v3 }
 0xccd   :  { %2507 = vpow2.f32 %v1421_v4 }
 0xcd5   :  { %v2506_v5 = vpop.eup %2505 }
 0xcd6   :  { %v1427_v7 = vsel %vm493_vm3, %v2506_v5, 0.0 }
 0xcd7   :  { %v2508_v6 = vpop.eup %2507 }
 0xcd8   :  { %v1430_v9 = vsel %vm493_vm3, %v2508_v6, 0.0 }
 0xce7   :  { %1428 = vadd.xlane.f32.xlu0 %v1427_v7  ;;  %1431 = vadd.xlane.f32.xlu1 %v1430_v9  ;;  %v2121_v7 = vld [vmem:[%s3124_s11 + $0x1] ss:$0 sm:$0xff] }
 0xd3f   :  { %v1411_v10 = vpop.xlane.xlu0 %1410  ;;  %v1414_v11 = vpop.xlane.xlu1 %1413 }
 0xd40   :  { %v1417_v12 = vsub.f32 %v1351_v54, %v1411_v10  ;;  %v1418_v13 = vsub.f32 %v1397_v56, %v1414_v11 }
 0xd42   :  { %v1423_v14 = vmul.f32 1.442695, %v1417_v12  ;;  %v1425_v8 = vmul.f32 1.442695, %v1418_v13 }
 0xd43   :  { %v1453_v15 = vpop.permute.xlu0 %1452  ;;  %v1502_v16 = vpop.permute.xlu1 %1501 }
 0xd44   :  { %2509 = vpow2.f32 %v1423_v14  ;;  %v1458_v17 = vsel %vm548_vm4, %v1453_v15, 0  ;;  %v1507_v18 = vsel %vm548_vm4, %v1502_v16, 0 }
 0xd45   :  { %2511 = vpow2.f32 %v1425_v8  ;;  %2355 = vmatpush3.bf16.msra.mxu1 %v1458_v17  ;;  %2361 = vmatpush3.bf16.msra.mxu0 %v1507_v18 }
 0xd46   :  { %2366 = vmatprep.subr.bf16.mxu1 %v2583_v2  ;;  %2372 = vmatprep.subr.bf16.mxu0 %v2583_v2 }
 0xd4e   :  { %v2510_v19 = vpop.eup %2509 }
 0xd4f   :  { %v2512_v20 = vpop.eup %2511  ;;  %v1433_v21 = vsel %vm493_vm3, %v2510_v19, 0.0 }
 0xd50   :  { %1434 = vadd.xlane.f32.xlu0 %v1433_v21  ;;  %v1436_v22 = vsel %vm493_vm3, %v2512_v20, 0.0 }
 0xd51   :  { %1437 = vadd.xlane.f32.xlu1 %v1436_v22 }
 0xd62   :  { %1550 = vrot.lane.b32.xlu1 %v2980_v34, %s2586_s3 }
 0xd66   :  { %1599 = vrot.lane.b32.xlu0 %v2978_v33, %s2586_s3 }
 0xd74   :  { %v1429_v23 = vpop.xlane.xlu0 %1428  ;;  %v1432_v24 = vpop.xlane.xlu1 %1431 }
 0xd75   :  { %2513 = vrcp.f32 %v1429_v23 }
 0xd76   :  { %2515 = vrcp.f32 %v1432_v24 }
 0xd7f   :  { %v2514_v25 = vpop.eup %2513 }
 0xd80   :  { %v2516_v26 = vpop.eup %2515  ;;  %v1440_v27 = vmul.f32 %v2514_v25, %v2506_v5 }
 0xd81   :  { %v1442_v30 = vmul.f32 %v2516_v26, %v2508_v6 }
 0xd82   :  { %v1447_v31 = vpack.c.bf16 %v1440_v27, %v1440_v27  ;;  %v2474_v27 = vld [vmem:[%s3127_s14 + $0x18] sm:$0xff]  }
 0xd83   :  { %v1448_v32 = vpack.c.bf16 %v1442_v30, %v1442_v30  ;;  %v2475_v30 = vld [vmem:[%s3129_s16 + $0x20] sm:$0xff]  }
 0xd84   :  { %2357 = vmatmul.mubr.msk.bf16.vlgmr.msra.gmra.mrb[36].mxu1 %vm493_vm3, %v1447_v31  ;;  %v2476_v31 = vld [vmem:[%s3129_s16 + $0x28] sm:$0xff]  }
 0xd85   :  { %2363 = vmatmul.mubr.msk.bf16.vlgmr.msra.gmra.mrb[40].mxu0 %vm493_vm3, %v1448_v32  ;;  %2368 = vmatprep.mubr.msk.bf16.mxu1 %vm2584_vm0, %v2583_v2 }
 0xd86   :  { %2374 = vmatprep.mubr.msk.bf16.mxu0 %vm2584_vm0, %v2583_v2 }
 0xddd   :  { %v1435_v33 = vpop.xlane.xlu0 %1434 }
 0xdde   :  { %2517 = vrcp.f32 %v1435_v33  ;;  %v1438_v34 = vpop.xlane.xlu1 %1437 }
 0xddf   :  { %2519 = vrcp.f32 %v1438_v34 }
 0xde1   :  { %v1600_v35 = vpop.permute.xlu0 %1599 }
 0xde2   :  { %v1605_v36 = vsel %vm548_vm4, %v1600_v35, 0  ;;  %v1551_v37 = vpop.permute.xlu1 %1550 }
 0xde3   :  { %v1556_v38 = vsel %vm548_vm4, %v1551_v37, 0  ;;  %2373 = vmatpush3.bf16.msra.mxu0 %v1605_v36 }
 0xde4   :  { %2367 = vmatpush3.bf16.msra.mxu1 %v1556_v38  ;;  %2386 = vmatprep.subr.bf16.mxu0 %v2583_v2 }
 0xde5   :  { %2378 = vmatprep.subr.bf16.mxu1 %v2583_v2 }
 0xde8   :  { %v2518_v39 = vpop.eup %2517 }
 0xde9   :  { %v2520_v41 = vpop.eup %2519  ;;  %v1444_v42 = vmul.f32 %v2518_v39, %v2510_v19 }
 0xdea   :  { %v1446_v43 = vmul.f32 %v2520_v41, %v2512_v20  ;;  %v2127_v41 = vld [vmem:[%s3125_s12 + $0x1] ss:$0 sm:$0xff] }
 0xdeb   :  { %v1449_v44 = vpack.c.bf16 %v1444_v42, %v1444_v42 }
 0xdec   :  { %v1450_v45 = vpack.c.bf16 %v1446_v43, %v1446_v43 }
 0xded   :  { %2369 = vmatmul.mubr.msk.bf16.vlgmr.msra.gmra.mrb[40].mxu1 %vm493_vm3, %v1449_v44 }
 0xdee   :  { %2375 = vmatmul.mubr.msk.bf16.vlgmr.msra.gmra.mrb[44].mxu0 %vm493_vm3, %v1450_v45  ;;  %2382 = vmatprep.mubr.msk.bf16.mxu1 %vm2584_vm0, %v2583_v2  ;;  %v2128_v45 = vld [vmem:[%s3126_s13 + $0x1] ss:$0 sm:$0xff] }
 0xdef   :  { %2390 = vmatprep.mubr.msk.bf16.mxu0 %vm2584_vm0, %v2583_v2  ;;  %2379 = vmatpush3.bf16.msra.mxu1 %v2471_v46 }
 0xdf0   :  { %2380 = vmatprep.subr.bf16.mxu1 %v2583_v2 }
 0xdf3   :  { %2381 = vmatpush3.bf16.msra.mxu1 %v2472_v57 }
 0xdf4   :  { %2394 = vmatprep.subr.bf16.mxu1 %v2583_v2 }
 0xe57   :  { %v1494_v47 = vpop.f32.mrb[36].mxu1 }
 0xe58   :  { %v1543_v48 = vpop.f32.mrb[40].mxu0  ;;  %v2358_v49 = vpop.f32.mrb[37].mxu1 }
 0xe59   :  { %v2364_v51 = vpop.f32.mrb[41].mxu0  ;;  %v1497_v52 = vpop.f32.mrb[38].mxu1 }
 0xe5a   :  { %v1546_v53 = vpop.f32.mrb[42].mxu0  ;;  %v2359_v54 = vpop.f32.mrb[39].mxu1  ;;  %v2477_v51 = vld [vmem:[%s3129_s16 + $0x30] sm:$0xff]   ;;  %v2478_v52 = vld [vmem:[%s3129_s16 + $0x38] sm:$0xff]  }
 0xe5b   :  { %v2365_v56 = vpop.f32.mrb[43].mxu0  ;;  %v2133_v53 = vld [vmem:[#allocation3 + $0x1] ss:$0 sm:$0xff] }
 0xec0   :  { %v1592_v50 = vpop.f32.mrb[40].mxu1 }
 0xec1   :  { %v1641_v28 = vpop.f32.mrb[44].mxu0  ;;  %v2370_v29 = vpop.f32.mrb[41].mxu1 }
 0xec2   :  { %v2451_v58 = vpack.i.bf16 %v1641_v28, %v1592_v50  ;;  %v2376_v59 = vpop.f32.mrb[45].mxu0  ;;  %v1595_v55 = vpop.f32.mrb[42].mxu1 }
 0xec3   :  { %v1644_v40 = vpop.f32.mrb[46].mxu0  ;;  %v2371_v60 = vpop.f32.mrb[43].mxu1 }
 0xec4   :  { %2452 = vrot.lane.b32.xlu1 %v2451_v58, %s2578_s6  ;;  %v2377_v61 = vpop.f32.mrb[47].mxu0  ;;  %v2145_v40 = vld [vmem:[#allocation5 + $0x1] ss:$0 sm:$0xff] }
 0xf36   :  { %v2453_v62 = vpop.permute.xlu1 %2452 }
 0xf37   :  { %v2455_v1 = vunpack.i.h.bf16 %v2453_v62  ;;  %v2454_v3 = vunpack.i.l.bf16 %v2453_v62 }
 0xf39   :  { %v1656_v4 = vsel %vm240_vm1, %v1543_v48, %v2455_v1  ;;  %v1655_v5 = vsel %vm240_vm1, %v1494_v47, %v2454_v3 }
 0xf3a   :  { %v1657_v6 = vpack.c.bf16 %v1656_v4, %v1655_v5 }
 0xf3c   :  { %2383 = vmatmul.mubr.msk.bf16.vlgmr.msra.gmra.mrb[44].mxu1 %vm178_vm2, %v1657_v6 }
 0xf3d   :  { %2402 = vmatprep.mubr.msk.bf16.mxu1 %vm2584_vm0, %v2583_v2  ;;  %2395 = vmatpush3.bf16.msra.mxu1 %v2475_v30 }
 0xf3e   :  { %2396 = vmatprep.subr.bf16.mxu1 %v2583_v2 }
 0xf41   :  { %2397 = vmatpush3.bf16.msra.mxu1 %v2476_v31 }
 0xf42   :  { %2398 = vmatprep.subr.bf16.mxu1 %v2583_v2 }
 0xf45   :  { %2399 = vmatpush3.bf16.msra.mxu1 %v2477_v51 }
 0xf46   :  { %2400 = vmatprep.subr.bf16.mxu1 %v2583_v2 }
 0xf49   :  { %2401 = vmatpush3.bf16.msra.mxu1 %v2478_v52 }
0x100f   :  { %v1720_v9 = vpop.f32.mrb[44].mxu1 }
0x1010   :  { %v1721_v10 = vadd.f32 %v2121_v7, %v1720_v9  ;;  %v2384_v11 = vpop.f32.mrb[45].mxu1 }
0x1011   :  { %v1723_v12 = vpop.f32.mrb[46].mxu1 }
0x1012   :  { %v1724_v13 = vadd.f32 %v2121_v7, %v1723_v12  ;;  %v2385_v14 = vpop.f32.mrb[47].mxu1  ;;  %v1727_v8 = vadd.f32 %v1721_v10, %v2943_v63 }
0x1014   :  { %v1733_v15 = vsel %vm178_vm2, %v1727_v8, 0.0  ;;  %v1728_v16 = vadd.f32 %v1724_v13, %v2945_v0  ;;  %v2473_v0 = vld [vmem:[%s3127_s14 + $0x10] sm:$0xff]  }
0x1015   :  { %1734 = vadd.xlane.f32.xlu0 %v1733_v15  ;;  %2387 = vmatpush3.bf16.msra.mxu0 %v2473_v0  ;;  %v2153_v0 = vld [vmem:[%s3131_s18 + $0x1] ss:$0 sm:$0xff] }
0x1016   :  { %v1736_v17 = vsel %vm178_vm2, %v1728_v16, 0.0  ;;  %2388 = vmatprep.subr.bf16.mxu0 %v2583_v2 }
0x1017   :  { %1737 = vadd.xlane.f32.xlu1 %v1736_v17 }
0x1019   :  { %2389 = vmatpush3.bf16.msra.mxu0 %v2474_v27 }
0x101a   :  { %2406 = vmatprep.subr.bf16.mxu0 %v2583_v2 }
0x10a2   :  { %v1735_v18 = vpop.xlane.xlu0 %1734 }
0x10a3   :  { %v1739_v19 = vmul.f32 0.03125, %v1735_v18 }
0x10a4   :  { %v1738_v20 = vpop.xlane.xlu1 %1737 }
0x10a5   :  { %v1741_v21 = vsub.f32 %v1727_v8, %v1739_v19  ;;  %v1740_v22 = vmul.f32 0.03125, %v1738_v20  ;;  %v2479_v19 = vld [vmem:[%s3133_s20] sm:$0xff]   ;;  %v2480_v20 = vld [vmem:[%s3133_s20 + $0x8] sm:$0xff]  }
0x10a7   :  { %v1742_v23 = vsub.f32 %v1728_v16, %v1740_v22  ;;  %v1743_v24 = vmul.f32 %v1741_v21, %v1741_v21 }
0x10a9   :  { %v1745_v25 = vsel %vm178_vm2, %v1743_v24, 0.0  ;;  %v1744_v26 = vmul.f32 %v1742_v23, %v1742_v23 }
0x10aa   :  { %1746 = vadd.xlane.f32.xlu0 %v1745_v25 }
0x10ab   :  { %v1748_v63 = vsel %vm178_vm2, %v1744_v26, 0.0 }
0x10ae   :  { %1749 = vadd.xlane.f32.xlu0 %v1748_v63 }
0x1137   :  { %v1747_v32 = vpop.xlane.xlu0 %1746 }
0x1138   :  { %v1751_v33 = vmul.f32 0.03125, %v1747_v32  ;;  %v2154_v32 = vld [vmem:[%s3132_s19 + $0x1] ss:$0 sm:$0xff] }
0x113a   :  { %v1753_v34 = vadd.f32 1e-05, %v1751_v33 }
0x113b   :  { %v1750_v35 = vpop.xlane.xlu0 %1749 }
0x113c   :  { %2521 = vrsqrt.f32 %v1753_v34  ;;  %v1752_v36 = vmul.f32 0.03125, %v1750_v35 }
0x113e   :  { %v1754_v37 = vadd.f32 1e-05, %v1752_v36 }
0x1140   :  { %2523 = vrsqrt.f32 %v1754_v37  ;;  %v2155_v37 = vld [vmem:[%s3134_s21] ss:$0 sm:$0xff] }
0x1146   :  { %v2522_v38 = vpop.eup %2521 }
0x1147   :  { %v1757_v39 = vmul.f32 %v2522_v38, %v1741_v21 }
0x1149   :  { %v1765_v43 = vmul.f32 %v2127_v41, %v1757_v39 }
0x114a   :  { %v2524_v42 = vpop.eup %2523 }
0x114b   :  { %v1758_v44 = vmul.f32 %v2524_v42, %v1742_v23  ;;  %v1773_v47 = vadd.f32 %v2128_v45, %v1765_v43 }
0x114d   :  { %v1766_v46 = vmul.f32 %v2127_v41, %v1758_v44 }
0x114f   :  { %v1774_v48 = vadd.f32 %v2128_v45, %v1766_v46 }
0x1151   :  { %v1775_v49 = vpack.c.bf16 %v1774_v48, %v1773_v47 }
0x1153   :  { %2391 = vmatmul.mubr.msk.bf16.vlgmr.msra.gmra.mrb[48].mxu0 %vm178_vm2, %v1775_v49 }
0x1154   :  { %2410 = vmatprep.mubr.msk.bf16.mxu0 %vm2584_vm0, %v2583_v2  ;;  %2407 = vmatpush3.bf16.msra.mxu0 %v2479_v19 }
0x1155   :  { %2408 = vmatprep.subr.bf16.mxu0 %v2583_v2 }
0x1158   :  { %2409 = vmatpush3.bf16.msra.mxu0 %v2480_v20 }
0x1226   :  { %v1838_v54 = vpop.f32.mrb[48].mxu0 }
0x1227   :  { %v1839_v56 = vadd.f32 %v2133_v53, %v1838_v54  ;;  %v2392_v57 = vpop.f32.mrb[49].mxu0 }
0x1228   :  { %v1841_v50 = vpop.f32.mrb[50].mxu0 }
0x1229   :  { %v1842_v28 = vadd.f32 %v2133_v53, %v1841_v50  ;;  %v2393_v29 = vpop.f32.mrb[51].mxu0  ;;  %v1845_v58 = vmax.f32 %v1839_v56, 0.0 }
0x122b   :  { %v1846_v59 = vmax.f32 %v1842_v28, 0.0 }
0x122d   :  { %v1847_v55 = vpack.c.bf16 %v1846_v59, %v1845_v58 }
0x122f   :  { %2403 = vmatmul.mubr.msk.bf16.vlgmr.msra.gmra.mrb[48].mxu1 %vm974_vm5, %v1847_v55 }
0x1302   :  { %v1926_v60 = vpop.f32.mrb[48].mxu1 }
0x1303   :  { %v1927_v61 = vadd.f32 %v2145_v40, %v1926_v60  ;;  %v2404_v62 = vpop.f32.mrb[49].mxu1 }
0x1304   :  { %v1929_v1 = vpop.f32.mrb[50].mxu1 }
0x1305   :  { %v1930_v3 = vadd.f32 %v2145_v40, %v1929_v1  ;;  %v2405_v4 = vpop.f32.mrb[51].mxu1  ;;  %v1933_v5 = vadd.f32 %v1927_v61, %v1773_v47 }
0x1307   :  { %v1939_v6 = vsel %vm178_vm2, %v1933_v5, 0.0  ;;  %v1934_v7 = vadd.f32 %v1930_v3, %v1774_v48 }
0x1308   :  { %1940 = vadd.xlane.f32.xlu1 %v1939_v6 }
0x1309   :  { %v1942_v9 = vsel %vm178_vm2, %v1934_v7, 0.0 }
0x130a   :  { %1943 = vadd.xlane.f32.xlu0 %v1942_v9 }
0x1395   :  { %v1941_v10 = vpop.xlane.xlu1 %1940 }
0x1396   :  { %v1945_v11 = vmul.f32 0.03125, %v1941_v10 }
0x1397   :  { %v1944_v12 = vpop.xlane.xlu0 %1943 }
0x1398   :  { %v1947_v13 = vsub.f32 %v1933_v5, %v1945_v11  ;;  %v1946_v14 = vmul.f32 0.03125, %v1944_v12 }
0x139a   :  { %v1948_v8 = vsub.f32 %v1934_v7, %v1946_v14  ;;  %v1949_v15 = vmul.f32 %v1947_v13, %v1947_v13 }
0x139c   :  { %v1951_v16 = vsel %vm178_vm2, %v1949_v15, 0.0  ;;  %v1950_v17 = vmul.f32 %v1948_v8, %v1948_v8 }
0x139d   :  { %1952 = vadd.xlane.f32.xlu1 %v1951_v16 }
0x139e   :  { %v1954_v18 = vsel %vm178_vm2, %v1950_v17, 0.0 }
0x139f   :  { %1955 = vadd.xlane.f32.xlu0 %v1954_v18 }
0x142a   :  { %v1953_v21 = vpop.xlane.xlu1 %1952 }
0x142b   :  { %v1957_v22 = vmul.f32 0.03125, %v1953_v21 }
0x142c   :  { %v1956_v23 = vpop.xlane.xlu0 %1955 }
0x142d   :  { %v1959_v24 = vadd.f32 1e-05, %v1957_v22  ;;  %v1958_v25 = vmul.f32 0.03125, %v1956_v23 }
0x142f   :  { %2525 = vrsqrt.f32 %v1959_v24  ;;  %v1960_v26 = vadd.f32 1e-05, %v1958_v25 }
0x1431   :  { %2527 = vrsqrt.f32 %v1960_v26 }
0x1439   :  { %v2526_v63 = vpop.eup %2525 }
0x143a   :  { %v1963_v27 = vmul.f32 %v2526_v63, %v1947_v13 }
0x143b   :  { %v2528_v2 = vpop.eup %2527 }
0x143c   :  { %v1971_v30 = vmul.f32 %v2153_v0, %v1963_v27  ;;  %v1964_v31 = vmul.f32 %v2528_v2, %v1948_v8 }
0x143e   :  { %v1972_v33 = vmul.f32 %v2153_v0, %v1964_v31  ;;  %v1979_v34 = vadd.f32 %v2154_v32, %v1971_v30 }
0x1440   :  { %v1980_v35 = vadd.f32 %v2154_v32, %v1972_v33 }
0x1442   :  { %v1981_v36 = vpack.c.bf16 %v1980_v35, %v1979_v34 }
0x1444   :  { %2411 = vmatmul.mubr.msk.bf16.vlgmr.msra.gmra.mrb[52].mxu0 %vm178_vm2, %v1981_v36 }
0x1517   :  { %v2042_v38 = vpop.f32.mrb[52].mxu0 }
0x1518   :  { %v2043_v39 = vadd.f32 %v2155_v37, %v2042_v38  ;;  %v2412_v41 = vpop.f32.mrb[53].mxu0 }
0x1519   :  { %v2045_v42 = vpop.f32.mrb[54].mxu0 }
0x151a   :  { %2049 = vst.msk [vmem:[%s3135_s22] sm:$0xff] %vm240_vm1, %v2043_v39  ;;  %v2046_v43 = vadd.f32 %v2155_v37, %v2045_v42  ;;  %v2413_v44 = vpop.f32.mrb[55].mxu0 }
0x151c   :  { %2050 = vst.msk [vmem:[%s3135_s22 + $0x8] sm:$0xff] %vm240_vm1, %v2046_v43 }
0x151d   :  { %2055 = vsyncpa [#allocation4], 1 }
0x151e   :  { %2056 = vsyncpa [#allocation6], 1 }

</bundles_post_ra>
